<compile_context>
chip_gen: v5e
topology: v5e:2x2
jax: 0.10.0
libtpu: 0.0.40
codegen_flags: <defaults>
</compile_context>

<pallas_src>
import math

import jax
import jax.numpy as jnp
from jax.experimental import pallas as pl
from jax.experimental.pallas import tpu as pltpu


def _pick_batch_tile(batch, seq):
    """Smallest divisor bt of batch with bt*seq >= 128 (fills the MXU M dim)."""
    if seq >= 128:
        return 1
    for bt in range(1, batch + 1):
        if batch % bt == 0 and bt * seq >= 128:
            return bt
    return batch


def _pick_head_group(n_head, head_dim):
    """Smallest group of heads whose joint width is lane-aligned (% 128 == 0).

    Falls back to all heads (group width == hidden_size, which always satisfies
    the BlockSpec 'equal to full dim' rule)."""
    for g in range(1, n_head + 1):
        if n_head % g == 0 and (g * head_dim) % 128 == 0:
            return g
    return n_head


def _make_kernel(bt, seq, heads_per_step, head_dim):
    def kernel(x_ref, wq_ref, bq_ref, wk_ref, bk_ref, wv_ref, bv_ref,
               wo_ref, bo_ref, o_ref):
        h = pl.program_id(1)

        @pl.when(h == 0)
        def _init():
            o_ref[...] = jnp.zeros_like(o_ref)

        x = x_ref[...]                                       # (bt*seq, H) bf16

        # Projections for this head group only; the (H, dg) / (dg, H) weight
        # slices are chosen by the BlockSpec index_map (DMA-level slicing),
        # so K = H is fully utilised and nothing is sliced along lanes here.
        q = jnp.dot(x, wq_ref[...], preferred_element_type=jnp.float32) + bq_ref[...]
        k = jnp.dot(x, wk_ref[...], preferred_element_type=jnp.float32) + bk_ref[...]
        v = jnp.dot(x, wv_ref[...], preferred_element_type=jnp.float32) + bv_ref[...]

        # Per (batch-in-tile, head-in-group) attention; the output projection is
        # accumulated straight into the resident output block (no concat, no
        # list of live per-head contexts).  Both loops have a single iteration
        # in lane-aligned configs (head_dim % 128 == 0, seq >= 128), so the
        # slices below are full-extent no-ops there.
        for bb in range(bt):
            r0 = bb * seq
            for hh in range(heads_per_step):
                c0 = hh * head_dim
                qh = q[r0:r0 + seq, c0:c0 + head_dim].astype(jnp.bfloat16)
                kh = k[r0:r0 + seq, c0:c0 + head_dim].astype(jnp.bfloat16)
                vh = v[r0:r0 + seq, c0:c0 + head_dim].astype(jnp.bfloat16)

                # 1/sqrt(head_dim) is folded into wq/bq in the wrapper.
                s = jnp.dot(qh, kh.T, preferred_element_type=jnp.float32)  # (seq, seq)
                m = jnp.max(s, axis=-1, keepdims=True)
                e = jnp.exp(s - m)
                p = e * pl.reciprocal(jnp.sum(e, axis=-1, keepdims=True), approx=True)

                ctx = jnp.dot(p.astype(jnp.bfloat16), vh,
                              preferred_element_type=jnp.float32)          # (seq, d)
                o_ref[r0:r0 + seq, :] += jnp.dot(
                    ctx.astype(jnp.bfloat16), wo_ref[c0:c0 + head_dim, :],
                    preferred_element_type=jnp.float32)

        @pl.when(h == pl.num_programs(1) - 1)
        def _finish():
            o_ref[...] += bo_ref[...]

    return kernel


def natural_attention(x, params, *, n_head):
    """Forward pass of NaturalAttention (no mask / cache).  x: (B, S, H) float32."""
    B, S, H = x.shape
    assert H % n_head == 0, "hidden size must be divisible by n_head"
    head_dim = H // n_head
    scale = 1.0 / math.sqrt(head_dim)

    # PyTorch Linear weights are (out, in): transpose to (in, out) so the kernel
    # computes x @ W + b; fold the softmax scale into the q projection; weights
    # go to bf16 for the MXU (f32 accumulation), biases stay f32.
    wq = (params["wq"].T * scale).astype(jnp.bfloat16)
    wk = params["wk"].T.astype(jnp.bfloat16)
    wv = params["wv"].T.astype(jnp.bfloat16)
    wo = params["wo"].T.astype(jnp.bfloat16)
    bq = (params["bq"] * scale).reshape(1, H).astype(jnp.float32)
    bk = params["bk"].reshape(1, H).astype(jnp.float32)
    bv = params["bv"].reshape(1, H).astype(jnp.float32)
    bo = params["bo"].reshape(1, H).astype(jnp.float32)

    heads_per_step = _pick_head_group(n_head, head_dim)
    dg = heads_per_step * head_dim                    # head-group width (lanes)
    bt = _pick_batch_tile(B, S)
    if (bt * S) % 8 != 0:
        bt = B                                        # full-extent block is always legal
    n_head_steps = n_head // heads_per_step
    rows = bt * S

    x2 = x.reshape(B * S, H).astype(jnp.bfloat16)     # fold batch into MXU rows

    out2 = pl.pallas_call(
        _make_kernel(bt, S, heads_per_step, head_dim),
        out_shape=jax.ShapeDtypeStruct((B * S, H), jnp.float32),
        grid_spec=pltpu.PrefetchScalarGridSpec(
            num_scalar_prefetch=0,
            grid=(B // bt, n_head_steps),
            in_specs=[
                pl.BlockSpec((rows, H), lambda b, h: (b, 0)),   # x rows (batch tile)
                pl.BlockSpec((H, dg), lambda b, h: (0, h)),     # wq cols for head group
                pl.BlockSpec((1, dg), lambda b, h: (0, h)),     # bq
                pl.BlockSpec((H, dg), lambda b, h: (0, h)),     # wk
                pl.BlockSpec((1, dg), lambda b, h: (0, h)),     # bk
                pl.BlockSpec((H, dg), lambda b, h: (0, h)),     # wv
                pl.BlockSpec((1, dg), lambda b, h: (0, h)),     # bv
                pl.BlockSpec((dg, H), lambda b, h: (h, 0)),     # wo rows for head group
                pl.BlockSpec((1, H), lambda b, h: (0, 0)),      # bo
            ],
            out_specs=pl.BlockSpec((rows, H), lambda b, h: (b, 0)),
        ),
        compiler_params=pltpu.CompilerParams(
            dimension_semantics=("parallel", "arbitrary"),
            vmem_limit_bytes=32 * 1024 * 1024,
        ),
    )(x2, wq, bq, wk, bk, wv, bv, wo, bo)

    return out2.reshape(B, S, H).astype(x.dtype)


def natural_attention_ref(x, params, *, n_head):
    """Pure-JAX f32 reference mirroring the PyTorch forward (no mask, no cache)."""
    B, S, H = x.shape
    d = H // n_head
    q = x @ params["wq"].T + params["bq"]
    k = x @ params["wk"].T + params["bk"]
    v = x @ params["wv"].T + params["bv"]
    q = q.reshape(B, S, n_head, d).transpose(0, 2, 1, 3)
    k = k.reshape(B, S, n_head, d).transpose(0, 2, 1, 3)
    v = v.reshape(B, S, n_head, d).transpose(0, 2, 1, 3)
    scores = jnp.einsum("bhqd,bhkd->bhqk", q, k) / math.sqrt(d)
    probs = jax.nn.softmax(scores, axis=-1)
    ctx = jnp.einsum("bhqk,bhkd->bhqd", probs, v)
    ctx = ctx.transpose(0, 2, 1, 3).reshape(B, S, H)
    return ctx @ params["wo"].T + params["bo"]


def _run_case(B, S, H, n_head):
    key = jax.random.PRNGKey(0)
    keys = jax.random.split(key, 9)
    bound = 1.0 / math.sqrt(H)  # nn.Linear default init scale
    params = {
        "wq": jax.random.uniform(keys[0], (H, H), jnp.float32, -bound, bound),
        "bq": jax.random.uniform(keys[1], (H,), jnp.float32, -bound, bound),
        "wk": jax.random.uniform(keys[2], (H, H), jnp.float32, -bound, bound),
        "bk": jax.random.uniform(keys[3], (H,), jnp.float32, -bound, bound),
        "wv": jax.random.uniform(keys[4], (H, H), jnp.float32, -bound, bound),
        "bv": jax.random.uniform(keys[5], (H,), jnp.float32, -bound, bound),
        "wo": jax.random.uniform(keys[6], (H, H), jnp.float32, -bound, bound),
        "bo": jax.random.uniform(keys[7], (H,), jnp.float32, -bound, bound),
    }
    x = jax.random.normal(keys[8], (B, S, H), jnp.float32)

    out = jax.block_until_ready(natural_attention(x, params, n_head=n_head))
    ref = natural_attention_ref(x, params, n_head=n_head)
    assert out.shape == (B, S, H)
    err = float(jnp.max(jnp.abs(out - ref)))
    assert jnp.allclose(out, ref, atol=2e-2, rtol=2e-2), (
        f"mismatch vs reference (max abs err {err})")


if __name__ == "__main__":
    # Lane-aligned config: head_dim = 128 -> one head per grid step, no in-kernel
    # slicing, lane-dense (H=256) output stores.
    _run_case(B=2, S=128, H=256, n_head=2)
    # Tiny config at the module's example scale: exercises the grouped-heads +
    # batch-row-folding fallback path (head_dim=8, S=8).
    _run_case(B=2, S=8, H=32, n_head=4)
    print("KERNEL_OK")
</pallas_src>

<mosaic_0001>
module attributes {stable_mosaic.version = 11 : i64} {
  func.func @kernel(%arg0: i32, %arg1: i32, %arg2: memref<128x256xbf16, #tpu.memory_space<vmem>>, %arg3: memref<256x128xbf16, #tpu.memory_space<vmem>>, %arg4: memref<1x128xf32, #tpu.memory_space<vmem>>, %arg5: memref<256x128xbf16, #tpu.memory_space<vmem>>, %arg6: memref<1x128xf32, #tpu.memory_space<vmem>>, %arg7: memref<256x128xbf16, #tpu.memory_space<vmem>>, %arg8: memref<1x128xf32, #tpu.memory_space<vmem>>, %arg9: memref<128x256xbf16, #tpu.memory_space<vmem>>, %arg10: memref<1x256xf32, #tpu.memory_space<vmem>>, %arg11: memref<128x256xf32, #tpu.memory_space<vmem>>) attributes {dimension_semantics = [#tpu.dimension_semantics<parallel>, #tpu.dimension_semantics<arbitrary>], iteration_bounds = array<i64: 2, 2>, scalar_prefetch = 0 : i64, scratch_operands = 0 : i64, tpu.core_type = #tpu.core_type<tc>, window_params = [{transform_indices = @transform_0, window_bounds = array<i64: 128, 256>}, {transform_indices = @transform_1, window_bounds = array<i64: 256, 128>}, {transform_indices = @transform_2, window_bounds = array<i64: 1, 128>}, {transform_indices = @transform_3, window_bounds = array<i64: 256, 128>}, {transform_indices = @transform_4, window_bounds = array<i64: 1, 128>}, {transform_indices = @transform_5, window_bounds = array<i64: 256, 128>}, {transform_indices = @transform_6, window_bounds = array<i64: 1, 128>}, {transform_indices = @transform_7, window_bounds = array<i64: 128, 256>}, {pipeline_mode = #tpu.pipeline_mode<synchronous>, transform_indices = @transform_8, window_bounds = array<i64: 1, 256>}, {transform_indices = @transform_9, window_bounds = array<i64: 128, 256>}]} {
    %c0_i32 = arith.constant 0 : i32
    %0 = arith.cmpi eq, %arg1, %c0_i32 : i32
    %1 = arith.extui %0 : i1 to i32
    %c0_i32_0 = arith.constant 0 : i32
    %2 = arith.cmpi ne, %1, %c0_i32_0 : i32
    scf.if %2 {
      %cst_28 = arith.constant 0.000000e+00 : f32
      %45 = vector.broadcast %cst_28 : f32 to vector<128x256xf32>
      %c0_29 = arith.constant 0 : index
      %c0_30 = arith.constant 0 : index
      %46 = vector.load %arg11[%c0_29, %c0_30] : memref<128x256xf32, #tpu.memory_space<vmem>>, vector<128x256xf32>
      tpu.vector_store %arg11[%c0_29, %c0_30], %45 {strides = array<i32>} : memref<128x256xf32, #tpu.memory_space<vmem>>, vector<128x256xf32>,
    } else {
    }
    %c0 = arith.constant 0 : index
    %c0_1 = arith.constant 0 : index
    %3 = vector.load %arg2[%c0, %c0_1] : memref<128x256xbf16, #tpu.memory_space<vmem>>, vector<128x256xbf16>
    %c0_2 = arith.constant 0 : index
    %c0_3 = arith.constant 0 : index
    %4 = vector.load %arg3[%c0_2, %c0_3] : memref<256x128xbf16, #tpu.memory_space<vmem>>, vector<256x128xbf16>
    %cst = arith.constant dense<0.000000e+00> : vector<128x128xf32>
    %5 = tpu.matmul %3, %4, %cst {dimension_numbers = #tpu.dot_dimension_numbers<[1], [0], [0], [1], [0, 0, 1, 1], [], []>} : vector<128x256xbf16>, vector<256x128xbf16>, vector<128x128xf32> -> vector<128x128xf32>
    %c0_4 = arith.constant 0 : index
    %c0_5 = arith.constant 0 : index
    %6 = vector.load %arg4[%c0_4, %c0_5] : memref<1x128xf32, #tpu.memory_space<vmem>>, vector<1x128xf32>
    %7 = vector.broadcast %6 : vector<1x128xf32> to vector<128x128xf32>
    %8 = arith.addf %5, %7 : vector<128x128xf32>
    %c0_6 = arith.constant 0 : index
    %c0_7 = arith.constant 0 : index
    %9 = vector.load %arg5[%c0_6, %c0_7] : memref<256x128xbf16, #tpu.memory_space<vmem>>, vector<256x128xbf16>
    %cst_8 = arith.constant dense<0.000000e+00> : vector<128x128xf32>
    %10 = tpu.matmul %3, %9, %cst_8 {dimension_numbers = #tpu.dot_dimension_numbers<[1], [0], [0], [1], [0, 0, 1, 1], [], []>} : vector<128x256xbf16>, vector<256x128xbf16>, vector<128x128xf32> -> vector<128x128xf32>
    %c0_9 = arith.constant 0 : index
    %c0_10 = arith.constant 0 : index
    %11 = vector.load %arg6[%c0_9, %c0_10] : memref<1x128xf32, #tpu.memory_space<vmem>>, vector<1x128xf32>
    %12 = vector.broadcast %11 : vector<1x128xf32> to vector<128x128xf32>
    %13 = arith.addf %10, %12 : vector<128x128xf32>
    %c0_11 = arith.constant 0 : index
    %c0_12 = arith.constant 0 : index
    %14 = vector.load %arg7[%c0_11, %c0_12] : memref<256x128xbf16, #tpu.memory_space<vmem>>, vector<256x128xbf16>
    %cst_13 = arith.constant dense<0.000000e+00> : vector<128x128xf32>
    %15 = tpu.matmul %3, %14, %cst_13 {dimension_numbers = #tpu.dot_dimension_numbers<[1], [0], [0], [1], [0, 0, 1, 1], [], []>} : vector<128x256xbf16>, vector<256x128xbf16>, vector<128x128xf32> -> vector<128x128xf32>
    %c0_14 = arith.constant 0 : index
    %c0_15 = arith.constant 0 : index
    %16 = vector.load %arg8[%c0_14, %c0_15] : memref<1x128xf32, #tpu.memory_space<vmem>>, vector<1x128xf32>
    %17 = vector.broadcast %16 : vector<1x128xf32> to vector<128x128xf32>
    %18 = arith.addf %15, %17 : vector<128x128xf32>
    %19 = arith.truncf %8 : vector<128x128xf32> to vector<128x128xbf16>
    %20 = arith.truncf %13 : vector<128x128xf32> to vector<128x128xbf16>
    %21 = arith.truncf %18 : vector<128x128xf32> to vector<128x128xbf16>
    %22 = tpu.transpose %20, [1, 0] : vector<128x128xbf16> -> vector<128x128xbf16>
    %cst_16 = arith.constant dense<0.000000e+00> : vector<128x128xf32>
    %23 = tpu.matmul %19, %22, %cst_16 {dimension_numbers = #tpu.dot_dimension_numbers<[1], [0], [0], [1], [0, 0, 1, 1], [], []>} : vector<128x128xbf16>, vector<128x128xbf16>, vector<128x128xf32> -> vector<128x128xf32>
    %cst_17 = arith.constant dense<0xFF800000> : vector<128xf32>
    %24 = vector.multi_reduction <maximumf>, %23, %cst_17 [1] : vector<128x128xf32> to vector<128xf32>
    %25 = vector.shape_cast %24 : vector<128xf32> to vector<128x1xf32>
    %26 = vector.broadcast %25 : vector<128x1xf32> to vector<128x128xf32>
    %27 = arith.subf %23, %26 : vector<128x128xf32>
    %28 = math.exp %27 : vector<128x128xf32>
    %cst_18 = arith.constant dense<0.000000e+00> : vector<128xf32>
    %29 = vector.multi_reduction <add>, %28, %cst_18 [1] : vector<128x128xf32> to vector<128xf32>
    %30 = vector.shape_cast %29 : vector<128xf32> to vector<128x1xf32>
    %31 = tpu.reciprocal %30 {approx = true} : vector<128x1xf32> -> vector<128x1xf32>
    %32 = vector.broadcast %31 : vector<128x1xf32> to vector<128x128xf32>
    %33 = arith.mulf %28, %32 : vector<128x128xf32>
    %34 = arith.truncf %33 : vector<128x128xf32> to vector<128x128xbf16>
    %cst_19 = arith.constant dense<0.000000e+00> : vector<128x128xf32>
    %35 = tpu.matmul %34, %21, %cst_19 {dimension_numbers = #tpu.dot_dimension_numbers<[1], [0], [0], [1], [0, 0, 1, 1], [], []>} : vector<128x128xbf16>, vector<128x128xbf16>, vector<128x128xf32> -> vector<128x128xf32>
    %c0_20 = arith.constant 0 : index
    %c0_21 = arith.constant 0 : index
    %36 = vector.load %arg11[%c0_20, %c0_21] : memref<128x256xf32, #tpu.memory_space<vmem>>, vector<128x256xf32>
    %37 = arith.truncf %35 : vector<128x128xf32> to vector<128x128xbf16>
    %c0_22 = arith.constant 0 : index
    %c0_23 = arith.constant 0 : index
    %38 = vector.load %arg9[%c0_22, %c0_23] : memref<128x256xbf16, #tpu.memory_space<vmem>>, vector<128x256xbf16>
    %cst_24 = arith.constant dense<0.000000e+00> : vector<128x256xf32>
    %39 = tpu.matmul %37, %38, %cst_24 {dimension_numbers = #tpu.dot_dimension_numbers<[1], [0], [0], [1], [0, 0, 1, 1], [], []>} : vector<128x128xbf16>, vector<128x256xbf16>, vector<128x256xf32> -> vector<128x256xf32>
    %40 = arith.addf %36, %39 : vector<128x256xf32>
    %c0_25 = arith.constant 0 : index
    %c0_26 = arith.constant 0 : index
    %41 = vector.load %arg11[%c0_25, %c0_26] : memref<128x256xf32, #tpu.memory_space<vmem>>, vector<128x256xf32>
    tpu.vector_store %arg11[%c0_25, %c0_26], %40 {strides = array<i32>} : memref<128x256xf32, #tpu.memory_space<vmem>>, vector<128x256xf32>,
    %c1_i32 = arith.constant 1 : i32
    %42 = arith.cmpi eq, %arg1, %c1_i32 : i32
    %43 = arith.extui %42 : i1 to i32
    %c0_i32_27 = arith.constant 0 : i32
    %44 = arith.cmpi ne, %43, %c0_i32_27 : i32
    scf.if %44 {
      %c0_28 = arith.constant 0 : index
      %c0_29 = arith.constant 0 : index
      %45 = vector.load %arg11[%c0_28, %c0_29] : memref<128x256xf32, #tpu.memory_space<vmem>>, vector<128x256xf32>
      %c0_30 = arith.constant 0 : index
      %c0_31 = arith.constant 0 : index
      %46 = vector.load %arg10[%c0_30, %c0_31] : memref<1x256xf32, #tpu.memory_space<vmem>>, vector<1x256xf32>
      %47 = vector.broadcast %46 : vector<1x256xf32> to vector<128x256xf32>
      %48 = arith.addf %45, %47 : vector<128x256xf32>
      %c0_32 = arith.constant 0 : index
      %c0_33 = arith.constant 0 : index
      %49 = vector.load %arg11[%c0_32, %c0_33] : memref<128x256xf32, #tpu.memory_space<vmem>>, vector<128x256xf32>
      tpu.vector_store %arg11[%c0_32, %c0_33], %48 {strides = array<i32>} : memref<128x256xf32, #tpu.memory_space<vmem>>, vector<128x256xf32>,
    } else {
    }
    return
  }
  func.func @transform_0(%arg0: i32, %arg1: i32) -> (i32, i32) {
    %c0_i32 = arith.constant 0 : i32
    %c0_i32_0 = arith.constant 0 : i32
    return %arg0, %c0_i32 : i32, i32
  }
  func.func @transform_1(%arg0: i32, %arg1: i32) -> (i32, i32) {
    %c0_i32 = arith.constant 0 : i32
    %c0_i32_0 = arith.constant 0 : i32
    return %c0_i32, %arg1 : i32, i32
  }
  func.func @transform_2(%arg0: i32, %arg1: i32) -> (i32, i32) {
    %c0_i32 = arith.constant 0 : i32
    %c0_i32_0 = arith.constant 0 : i32
    return %c0_i32, %arg1 : i32, i32
  }
  func.func @transform_3(%arg0: i32, %arg1: i32) -> (i32, i32) {
    %c0_i32 = arith.constant 0 : i32
    %c0_i32_0 = arith.constant 0 : i32
    return %c0_i32, %arg1 : i32, i32
  }
  func.func @transform_4(%arg0: i32, %arg1: i32) -> (i32, i32) {
    %c0_i32 = arith.constant 0 : i32
    %c0_i32_0 = arith.constant 0 : i32
    return %c0_i32, %arg1 : i32, i32
  }
  func.func @transform_5(%arg0: i32, %arg1: i32) -> (i32, i32) {
    %c0_i32 = arith.constant 0 : i32
    %c0_i32_0 = arith.constant 0 : i32
    return %c0_i32, %arg1 : i32, i32
  }
  func.func @transform_6(%arg0: i32, %arg1: i32) -> (i32, i32) {
    %c0_i32 = arith.constant 0 : i32
    %c0_i32_0 = arith.constant 0 : i32
    return %c0_i32, %arg1 : i32, i32
  }
  func.func @transform_7(%arg0: i32, %arg1: i32) -> (i32, i32) {
    %c0_i32 = arith.constant 0 : i32
    %c0_i32_0 = arith.constant 0 : i32
    return %arg1, %c0_i32 : i32, i32
  }
  func.func @transform_8(%arg0: i32, %arg1: i32) -> (i32, i32) {
    %c0_i32 = arith.constant 0 : i32
    %c0_i32_0 = arith.constant 0 : i32
    %c0_i32_1 = arith.constant 0 : i32
    return %c0_i32, %c0_i32_0 : i32, i32
  }
  func.func @transform_9(%arg0: i32, %arg1: i32) -> (i32, i32) {
    %c0_i32 = arith.constant 0 : i32
    %c0_i32_0 = arith.constant 0 : i32
    return %arg0, %c0_i32 : i32, i32
  }
}

</mosaic_0001>

<bundles_post_ra>
// kernel: tpu_custom_call.1
= control target key start
LH: loop header
LB: loop body
LE: loop exit
PB: predicated region body
PF: predicated region fallthrough
CT: control target
= control target key end

     0   :  { %s4367_s0 = inlined_call_operand.hbm [shape: bf16[256,256], index: 0, kind: input, shape index: {}]   ;;  %s4368_s1 = inlined_call_operand.hbm [shape: bf16[256,256], index: 1, kind: input, shape index: {}]   ;;  %s4369_s2 = inlined_call_operand.hbm [shape: f32[1,256], index: 2, kind: input, shape index: {}]   ;;  %s4370_s3 = inlined_call_operand.hbm [shape: bf16[256,256], index: 3, kind: input, shape index: {}]   ;;  %s4371_s4 = inlined_call_operand.vmem [shape: f32[1,256], index: 4, kind: input, shape index: {}]   ;;  %s4372_s5 = inlined_call_operand.hbm [shape: bf16[256,256], index: 5, kind: input, shape index: {}]   ;;  %s4373_s6 = inlined_call_operand.vmem [shape: f32[1,256], index: 6, kind: input, shape index: {}]   ;;  %s4374_s7 = inlined_call_operand.hbm [shape: bf16[256,256], index: 7, kind: input, shape index: {}]   ;;  %s4375_s8 = inlined_call_operand.vmem [shape: f32[1,256], index: 8, kind: input, shape index: {}]   ;;  %s4376_s9 = inlined_call_operand.hbm [shape: f32[256,256], index: 9, kind: output, shape index: {}]  }
   0x1   :  { %4393 = sst [smem:[#allocation34_spill]] %s4367_s0 }
   0x2   :  { %4394 = sst [smem:[#allocation35_spill]] %s4368_s1 }
   0x3   :  { %4395 = sst [smem:[#allocation36_spill]] %s4369_s2 }
   0x4   :  { %4396 = sst [smem:[#allocation37_spill]] %s4370_s3 }
   0x5   :  { %4397 = sst [smem:[#allocation38_spill]] %s4371_s4 }
   0x6   :  { %4398 = sst [smem:[#allocation39_spill]] %s4373_s6 }
   0x7   :  { %4399 = sst [smem:[#allocation40_spill]] %s4374_s7 }
   0x8   :  { %4400 = sst [smem:[#allocation41_spill]] %s4375_s8 }
   0x9   :  { %4401 = sst [smem:[#allocation42_spill]] %s4376_s9 }
   0xa   :  { %14 = vsyncpa [#allocation3], 0 }
   0xb   :  { %16 = vsyncpa [#allocation3 + $0x1], 0 }
   0xc   :  { %17 = vsyncpa [#allocation6], 0 }
   0xd   :  { %19 = vsyncpa [#allocation6 + $0x1], 0 }
   0xe   :  { %20 = vsyncpa [#allocation9], 0 }
   0xf   :  { %22 = vsyncpa [#allocation9 + $0x1], 0 }
  0x10   :  { %23 = vsyncpa [#allocation12], 0 }
  0x11   :  { %25 = vsyncpa [#allocation12 + $0x1], 0 }
  0x12   :  { %26 = vsyncpa [#allocation4], 0 }
  0x13   :  { %28 = vsyncpa [#allocation4 + $0x1], 0  ;;  %s3345_s30 = smov 0   ;;  %s3347_s10 = smov 0  }
  0x14   :  { %s3349_s11 = smov 0   ;;  %s3351_s12 = smov 0  }
  0x15   :  { %s3353_s13 = smov 0   ;;  %s3355_s14 = smov 0  }
  0x16   :  { %s3357_s15 = smov 0   ;;  %s3359_s16 = smov 0  }
  0x17   :  { %s3361_s17 = smov 0   ;;  %s3363_s18 = smov 0  }
  0x18   :  { %s3365_s19 = smov 0  }
  0x19 LB: > { %4402 = sst [smem:[#allocation19_spill]] %s3254_s11  ;;  %p61_p0 = scmp.eq.s32.totalorder %s3286_s19, 0  ;;  %s3286_s19 = sphi %s3365_s19, %s34_s19   ;;  %s3282_s18 = sphi %s3363_s18, %s4456_s18   ;;  %s3278_s17 = sphi %s3361_s17, %s4462_s17   ;;  %s3274_s16 = sphi %s3359_s16, %s4454_s16   ;;  %s3270_s15 = sphi %s3357_s15, %s4461_s15   ;;  %s3266_s14 = sphi %s3355_s14, %s4453_s14   ;;  %s3262_s13 = sphi %s3353_s13, %s4460_s13   ;;  %s3258_s12 = sphi %s3351_s12, %s4459_s12   ;;  %s3254_s11 = sphi %s3349_s11, %s4451_s11   ;;  %s3250_s10 = sphi %s3347_s10, %s4458_s10   ;;  %s3246_s30 = sphi %s3345_s30, %s4457_s30  }
  0x1a   : > { %4403 = sst [smem:[#allocation20_spill]] %s3258_s12  ;;  %p86_p1 = scmp.ne.s32.totalorder %s3254_s11, %s3250_s10 }
  0x1b   : > { %4404 = sst [smem:[#allocation21_spill]] %s3266_s14  ;;  %p4383_p2 = scmp.lt.s32.totalorder %s3286_s19, 4 }
  0x1c   : > { %4405 = sst [smem:[#allocation22_spill]] %s3270_s15  ;;  %p88_p3 = por %p86_p1, %p61_p0 }
  0x1d   : > { %4406 = sst [smem:[#allocation23_spill]] %s3274_s16  ;;  %s345_s21 = sand.u32 1, %s3286_s19  }
  0x1e   : > { %4407 = sst [smem:[#allocation24_spill]] %s3282_s18  ;;  %s3409_s22 = sand.u32 1, %s3254_s11  }
  0x1f   : > { %s3412_s23 = sshll.u32 %s3409_s22, 7  ;;  %s3415_s24 = sshll.u32 %s3278_s17, 2 }
  0x20   : > { %s4408_s1 = sld [smem:[#allocation35_spill]]  ;;  %s349_s29 = scalar_lea.vmem [#allocation5], %s3412_s23 }
  0x21   : > { %s356_s20 = sshll.u32 %s349_s29, 4  ;;  %p3424_p4 = pnand %p4383_p2, %p88_p3  ;;  %s357_s20 = int_to_ptr.vmem [resolvable:$true] %s356_s20 }
  0x22   : > { %p2334_p5 = scmp.ge.s32.totalorder %s3286_s19, 1  ;;  %p458_p6 = scmp.lt.s32.totalorder %s3286_s19, 5 }
  0x23   : > { %s3430_s25 = scalar_lea.sflag [#allocation6], %s345_s21  ;;  %s4381_s26 = smov 128  }
  0x24   : > { %s4380_s29 = smov 4   ;;  %p3438_p7 = pnand %p2334_p5, %p458_p6 }
  0x25   : > { %s4411_s3 = sld [smem:[#allocation37_spill]]  ;;  %s387_s15 = scalar_lea.vmem [#allocation8], %s3412_s23 }
  0x26   : > { %s353_s27 = scalar_lea.hbm %s4408_s1, %s3415_s24  ;;  %s394_s7 = sshll.u32 %s387_s15, 4  ;;  %s395_s7 = int_to_ptr.vmem [resolvable:$true] %s394_s7 }
  0x27   : > { %s354_s28 = sshll.u32 %s353_s27, 4  ;;  %s4379_s27 = smov 64   ;;  %s355_s28 = int_to_ptr.hbm [resolvable:$true] %s354_s28 }
  0x28   : > { %2791 = dma.hbm_to_vmem [thread:$0]  (!%p3424_p4), %s355_s28, 2048, %s357_s20, %s3430_s25, %s4381_s26, %s4379_s27, %s4380_s29  }
  0x29   : > { %s3447_s20 = scalar_lea.sflag [#allocation9], %s345_s21  ;;  %s2317_s8 = sadd.s32 4294967294, %s3286_s19  }
  0x2a   : > { %s43_s15 = sadd.s32 1, %s3278_s17  ;;  %s46_s16 = sadd.s32 1, %s3282_s18 }
  0x2b   : > { %s391_s6 = scalar_lea.hbm %s4411_s3, %s3415_s24  ;;  %p44_p8 = scmp.ge.s32.totalorder %s43_s15, 2 }
  0x2c   : > { %s392_s4 = sshll.u32 %s391_s6, 4  ;;  %s3456_s6 = sadd.s32 4294967295, %s3286_s19   ;;  %s393_s4 = int_to_ptr.hbm [resolvable:$true] %s392_s4 }
  0x2d   : > { %2797 = dma.hbm_to_vmem [thread:$0]  (!%p3424_p4), %s393_s4, 2048, %s395_s7, %s3447_s20, %s4381_s26, %s4379_s27, %s4380_s29  }
  0x2e   : > { %s53_s21 = sadd.s32 1, %s3266_s14  ;;  %p60_p9 = scmp.ne.s32.totalorder %s3266_s14, %s3262_s13 }
  0x2f   : > { %p66_p10 = scmp.ne.s32.totalorder %s3262_s13, %s3258_s12  ;;  %s4464_s15 = smov (%p44_p8, %s43_s15), 0 }
  0x30   : > { %4412 = sst [smem:[#allocation25_spill]] %s4464_s15  ;;  %s4466_s16 = smov (!%p44_p8, %s46_s16), %s3282_s18 }
  0x31   : > { %p3474_p11 = por %p61_p0, %p60_p9  ;;  %p67_p12 = scmp.eq.s32.totalorder %s3456_s6, 0 }
  0x32   : > { %p48_p13 = scmp.ge.s32.totalorder %s4466_s16, 2  ;;  %s76_s7 = ssub.s32 %s3278_s17, %s4464_s15 }
  0x33   : > { %p3484_p1 = por %p67_p12, %p66_p10  ;;  %p77_p3 = scmp.eq.s32.totalorder %s76_s7, 0 }
  0x34   : > { %s4468_s16 = smov (%p48_p13, %s4466_s16), 0  ;;  %s4416_s27 = sadd.s32 1, %s3254_s11 }
  0x35   : > { %4415 = sst [smem:[#allocation26_spill]] %s4468_s16  ;;  %s50_s26 = ssub.s32 %s3282_s18, %s4468_s16 }
  0x36   : > { %s3493_s29 = scalar_select %p77_p3, %s3254_s11, %s4416_s27  }
  0x37   : > { %p92_p0 = scmp.ne.s32.totalorder %s3250_s10, %s3246_s30  ;;  %p51_p5 = scmp.eq.s32.totalorder %s50_s26, 0 }
  0x38   : > { %4417 = sst [smem:[#allocation27_spill]] %s3493_s29  ;;  %p293_p6 = scmp.eq.s32.totalorder %s3456_s6, 3 }
  0x39   : > { %p3500_p8 = por %p92_p0, %p67_p12  ;;  %p299_p2 = scmp.eq.s32.totalorder %s2317_s8, 3 }
  0x3a   : > { %s3505_s15 = scalar_select %p51_p5, %s3266_s14, %s53_s21  }
  0x3b   : > { %p3510_p13 = por %p293_p6, %p60_p9  ;;  %p3517_p3 = por %p299_p2, %p66_p10 }
  0x3c   : > { %4419 = sst [smem:[#allocation28_spill]] %s3505_s15  ;;  %s322_s26 = sand.u32 1, %s3266_s14  }
  0x3d   : > { %s4420_s7 = scalar_select %p3510_p13, 1, 0 }
  0x3e   : > { %s4422_s30 = scalar_select %p3517_p3, 1, 0 }
  0x3f   : > { %4421 = sst [smem:[#allocation29_spill]] %s4420_s7  ;;  %s2670_s27 = sshll.u32 %s3282_s18, 7 }
  0x40   : > { %4423 = sst [smem:[#allocation30_spill]] %s4422_s30  ;;  %s2320_s16 = sshll.u32 %s322_s26, 7 }
  0x41   : > { %s4424_s0 = sld [smem:[#allocation34_spill]]  ;;  %s326_s15 = scalar_lea.vmem [#allocation2], %s2320_s16 }
  0x42   : > { %s335_s7 = sshll.u32 %s326_s15, 4  ;;  %p4425_p2 = scmp.lt.s32.totalorder %s3286_s19, 4  ;;  %s336_s7 = int_to_ptr.vmem [resolvable:$true] %s335_s7 }
  0x43   : > { %s4426_s2 = sld [smem:[#allocation36_spill]]  ;;  %s323_s29 = scalar_lea.sflag [#allocation3], %s322_s26 }
  0x44   : > { %p2786_p9 = pnand %p4425_p2, %p3474_p11  ;;  %s369_s15 = scalar_lea.vmem [#allocation7], %s3409_s22 }
  0x45   : > { %s376_s16 = sshll.u32 %s369_s15, 4  ;;  %s418_s30 = scalar_lea.hbm %s4372_s5, %s3415_s24  ;;  %s377_s16 = int_to_ptr.vmem [resolvable:$true] %s376_s16 }
  0x46   : > { %s419_s26 = sshll.u32 %s418_s30, 4  ;;  %s4430_s12 = sld [smem:[#allocation40_spill]]  ;;  %s420_s26 = int_to_ptr.hbm [resolvable:$true] %s419_s26 }
  0x47   : > { %s332_s8 = scalar_lea.hbm %s4424_s0, %s2670_s27  ;;  %s3291_s27 = smov 8  }
  0x48   : > { %s333_s21 = sshll.u32 %s332_s8, 4  ;;  %s4427_s8 = smov 128   ;;  %s334_s21 = int_to_ptr.hbm [resolvable:$true] %s333_s21 }
  0x49   : > { %s372_s18 = scalar_lea.hbm %s4426_s2, %s3278_s17  ;;  %s4428_s2 = smov 4  }
  0x4a   : > { %s374_s11 = sshll.u32 %s372_s18, 4  ;;  %s414_s18 = scalar_lea.vmem [#allocation10], %s3412_s23  ;;  %s375_s11 = int_to_ptr.hbm [resolvable:$true] %s374_s11 }
  0x4b   : > { %2788 = dma.hbm_to_vmem [thread:$0]  (!%p2786_p9), %s334_s21, 2048, %s336_s7, %s323_s29, %s4427_s8, %s4427_s8, %s3291_s27  }
  0x4c   : > { %2794 = dma.hbm_to_vmem [thread:$0]  (!%p3424_p4), %s375_s11, 16, %s377_s16, %s3430_s25  }
  0x4d   : > { %s421_s0 = sshll.u32 %s414_s18, 4  ;;  %s4429_s7 = smov 64   ;;  %s422_s0 = int_to_ptr.vmem [resolvable:$true] %s421_s0 }
  0x4e   : > { %2800 = dma.hbm_to_vmem [thread:$0]  (!%p3424_p4), %s420_s26, 2048, %s422_s0, %s3447_s20, %s4427_s8, %s4429_s7, %s4428_s2  }
  0x4f   : > { %s2672_s21 = sshll.u32 %s3278_s17, 7  ;;  %s441_s11 = scalar_lea.vmem [#allocation11], %s3412_s23 }
  0x50   : > { %s447_s25 = scalar_lea.hbm %s4430_s12, %s2672_s21  ;;  %s450_s16 = sshll.u32 %s441_s11, 4  ;;  %s451_s16 = int_to_ptr.vmem [resolvable:$true] %s450_s16 }
  0x51   : > { %s448_s4 = sshll.u32 %s447_s25, 4  ;;  %s438_s24 = scalar_lea.sflag [#allocation12], %s3409_s22  ;;  %s449_s4 = int_to_ptr.hbm [resolvable:$true] %s448_s4 }
  0x52   : > { %2803 = dma.hbm_to_vmem [thread:$0]  (!%p3424_p4), %s449_s4, 2048, %s451_s16, %s438_s24, %s4427_s8, %s4427_s8, %s3291_s27  }
  0x53   : > { %462 = sbr.rel (%p3438_p7) target bundleno = 1474 (0x5c2), region = 56 }
  0x58   : > { %s3564_s0 = sand.u32 1, %s3262_s13  }
  0x59   : > { %s2335_s2 = sshll.u32 %s3564_s0, 7  ;;  %s465_s12 = scalar_lea.sflag [#allocation3], %s3564_s0 }
  0x5a   : > { %s3568_s23 = scalar_lea.vmem [#allocation2], %s2335_s2 }
  0x5b   : > { %3225 = dma.done.wait (%p3484_p1), %s465_s12, 2048  }
  0x5c   : > { %3227 = vsyncadd (%p3484_p1), %s465_s12, 4294965248  ;;  %s474_s1 = sand.u32 1, %s3456_s6   ;;  %s3576_s9 = sand.u32 1, %s3250_s10  }
  0x5d   : > { %s2336_s22 = sshll.u32 %s3576_s9, 7  ;;  %s475_s20 = scalar_lea.sflag [#allocation6], %s474_s1 }
  0x5e   : > { %s3579_s27 = scalar_lea.vmem [#allocation5], %s2336_s22 }
  0x5f   : > { %3229 = dma.done.wait (%p3500_p8), %s475_s20, 2064  }
  0x60   : > { %3231 = vsyncadd (%p3500_p8), %s475_s20, 4294965232  ;;  %s487_s28 = scalar_lea.vmem [#allocation7], %s3576_s9  ;;  %s494_s8 = scalar_lea.sflag [#allocation9], %s474_s1 }
  0x61   : > { %s3586_s14 = scalar_lea.vmem [#allocation8], %s2336_s22 }
  0x62   : > { %3233 = dma.done.wait (%p3500_p8), %s494_s8, 4096  }
  0x63   : > { %3235 = vsyncadd (%p3500_p8), %s494_s8, 4294963200  ;;  %s3592_s6 = scalar_lea.vmem [#allocation10], %s2336_s22  ;;  %s514_s30 = scalar_lea.sflag [#allocation12], %s3576_s9 }
  0x64   : > { %s3595_s18 = scalar_lea.vmem [#allocation11], %s2336_s22 }
  0x65   : > { %3237 = dma.done.wait (%p3500_p8), %s514_s30, 2048  }
  0x66   : > { %3239 = vsyncadd (%p3500_p8), %s514_s30, 4294965248  ;;  %s4431_s26 = sld [smem:[#allocation22_spill]]  ;;  %s2340_s7 = sshll.u32 %s3564_s0, 8 }
  0x67   : > { %s4432_s25 = sld [smem:[#allocation38_spill]]  ;;  %s3614_s12 = scalar_lea.vmem [#allocation13], %s2340_s7 }
  0x68   : > { %s4433_s24 = sld [smem:[#allocation39_spill]] }
  0x6c   : > { %p584_p4 = scmp.lt.s32.totalorder %s4431_s26, 1  ;;  %p2341_p7 = scmp.ne.s32.totalorder %s4431_s26, 0 }
  0x6e   : > { %s3604_s21 = scalar_select %p584_p4, %s4431_s26, 1 }
  0x6f   : > { %595 = sbr.rel (%p2341_p7) target bundleno = 149 (0x95), region = 84 }
  0x70   : > { %s586_s11 = scalar_lea.vmem %s4432_s25, %s3604_s21  ;;  %s589_s2 = scalar_lea.vmem %s4433_s24, %s3604_s21 }
  0x74   : > { %v3292_v0 = vmov 0.0  }
  0x75   : > { %596 = vst [vmem:[%s3614_s12] sm:$0xff] %v3292_v0 }
  0x76   : > { %597 = vst [vmem:[%s3614_s12 + $0x8] sm:$0xff] %v3292_v0 }
  0x77   : > { %598 = vst [vmem:[%s3614_s12 + $0x10] sm:$0xff] %v3292_v0 }
  0x78   : > { %599 = vst [vmem:[%s3614_s12 + $0x18] sm:$0xff] %v3292_v0 }
  0x79   : > { %600 = vst [vmem:[%s3614_s12 + $0x20] sm:$0xff] %v3292_v0 }
  0x7a   : > { %601 = vst [vmem:[%s3614_s12 + $0x28] sm:$0xff] %v3292_v0 }
  0x7b   : > { %602 = vst [vmem:[%s3614_s12 + $0x30] sm:$0xff] %v3292_v0 }
  0x7c   : > { %603 = vst [vmem:[%s3614_s12 + $0x38] sm:$0xff] %v3292_v0 }
  0x7d   : > { %604 = vst [vmem:[%s3614_s12 + $0x40] sm:$0xff] %v3292_v0 }
  0x7e   : > { %605 = vst [vmem:[%s3614_s12 + $0x48] sm:$0xff] %v3292_v0 }
  0x7f   : > { %606 = vst [vmem:[%s3614_s12 + $0x50] sm:$0xff] %v3292_v0 }
  0x80   : > { %607 = vst [vmem:[%s3614_s12 + $0x58] sm:$0xff] %v3292_v0 }
  0x81   : > { %608 = vst [vmem:[%s3614_s12 + $0x60] sm:$0xff] %v3292_v0 }
  0x82   : > { %609 = vst [vmem:[%s3614_s12 + $0x68] sm:$0xff] %v3292_v0 }
  0x83   : > { %610 = vst [vmem:[%s3614_s12 + $0x70] sm:$0xff] %v3292_v0 }
  0x84   : > { %611 = vst [vmem:[%s3614_s12 + $0x78] sm:$0xff] %v3292_v0 }
  0x85   : > { %612 = vst [vmem:[%s3614_s12 + $0x80] sm:$0xff] %v3292_v0 }
  0x86   : > { %613 = vst [vmem:[%s3614_s12 + $0x88] sm:$0xff] %v3292_v0 }
  0x87   : > { %614 = vst [vmem:[%s3614_s12 + $0x90] sm:$0xff] %v3292_v0 }
  0x88   : > { %615 = vst [vmem:[%s3614_s12 + $0x98] sm:$0xff] %v3292_v0 }
  0x89   : > { %616 = vst [vmem:[%s3614_s12 + $0xa0] sm:$0xff] %v3292_v0 }
  0x8a   : > { %617 = vst [vmem:[%s3614_s12 + $0xa8] sm:$0xff] %v3292_v0 }
  0x8b   : > { %618 = vst [vmem:[%s3614_s12 + $0xb0] sm:$0xff] %v3292_v0 }
  0x8c   : > { %619 = vst [vmem:[%s3614_s12 + $0xb8] sm:$0xff] %v3292_v0 }
  0x8d   : > { %620 = vst [vmem:[%s3614_s12 + $0xc0] sm:$0xff] %v3292_v0 }
  0x8e   : > { %621 = vst [vmem:[%s3614_s12 + $0xc8] sm:$0xff] %v3292_v0 }
  0x8f   : > { %622 = vst [vmem:[%s3614_s12 + $0xd0] sm:$0xff] %v3292_v0 }
  0x90   : > { %623 = vst [vmem:[%s3614_s12 + $0xd8] sm:$0xff] %v3292_v0 }
  0x91   : > { %624 = vst [vmem:[%s3614_s12 + $0xe0] sm:$0xff] %v3292_v0 }
  0x92   : > { %625 = vst [vmem:[%s3614_s12 + $0xe8] sm:$0xff] %v3292_v0 }
  0x93   : > { %626 = vst [vmem:[%s3614_s12 + $0xf0] sm:$0xff] %v3292_v0 }
  0x94   : > { %627 = vst [vmem:[%s3614_s12 + $0xf8] sm:$0xff] %v3292_v0 }
  0x95 PF: > { %v2696_v1 = vld [vmem:[%s3579_s27 + $0x38] sm:$0xff]  ;;  %v2695_v3 = vld [vmem:[%s3579_s27 + $0x30] sm:$0xff]  ;;  %v2694_v5 = vld [vmem:[%s3579_s27 + $0x28] sm:$0xff] }
  0x96   : > { %v2704_v2 = vld [vmem:[%s3579_s27 + $0x78] sm:$0xff]  ;;  %2755 = vmatpush.bf16.msra.mxu2 %v2696_v1  ;;  %v2703_v4 = vld [vmem:[%s3579_s27 + $0x70] sm:$0xff]  ;;  %856 = vmatpush.bf16.msra.mxu0 %v2696_v1  ;;  %v2702_v6 = vld [vmem:[%s3579_s27 + $0x68] sm:$0xff] }
  0x97   : > { %2763 = vmatpush.bf16.msra.mxu3 %v2704_v2  ;;  %905 = vmatpush.bf16.msra.mxu1 %v2704_v2  ;;  %v2693_v7 = vld [vmem:[%s3579_s27 + $0x20] sm:$0xff]  ;;  %v2692_v9 = vld [vmem:[%s3579_s27 + $0x18] sm:$0xff]  ;;  %v2691_v11 = vld [vmem:[%s3579_s27 + $0x10] sm:$0xff] }
  0x98   : > { %v2701_v8 = vld [vmem:[%s3579_s27 + $0x60] sm:$0xff]  ;;  %v2700_v10 = vld [vmem:[%s3579_s27 + $0x58] sm:$0xff]  ;;  %v2699_v12 = vld [vmem:[%s3579_s27 + $0x50] sm:$0xff] }
  0x99   : > { %v2690_v13 = vld [vmem:[%s3579_s27 + $0x8] sm:$0xff]  ;;  %v2689_v15 = vld [vmem:[%s3579_s27] sm:$0xff]  ;;  %v2711_v25 = vld [vmem:[%s3586_s14 + $0x30] sm:$0xff] }
  0x9a   : > { %2756 = vmatpush.bf16.msra.mxu2 %v2695_v3  ;;  %857 = vmatpush.bf16.msra.mxu0 %v2695_v3  ;;  %v2698_v14 = vld [vmem:[%s3579_s27 + $0x48] sm:$0xff]  ;;  %v2697_v16 = vld [vmem:[%s3579_s27 + $0x40] sm:$0xff]  ;;  %v2719_v26 = vld [vmem:[%s3586_s14 + $0x70] sm:$0xff]  ;;  %s4443_s27 = sld [smem:[#allocation22_spill]] }
  0x9b   : > { %2764 = vmatpush.bf16.msra.mxu3 %v2703_v4  ;;  %906 = vmatpush.bf16.msra.mxu1 %v2703_v4  ;;  %v2376_v17 = vld [vmem:[%s3568_s23 + $0x40] sm:$0xf]  ;;  %v2682_v18 = vld [vmem:[%s3568_s23 + $0x44] sm:$0xf0]  ;;  %v2681_v19 = vld [vmem:[%s3568_s23 + $0x44] sm:$0xf] }
  0x9c   : > { %v2378_v20 = vld [vmem:[%s3568_s23 + $0x48] sm:$0xf0]  ;;  %v3669_v21 = vor.u32 %v2682_v18, %v2376_v17  ;;  %v2712_v23 = vld [vmem:[%s3586_s14 + $0x38] sm:$0xff]  ;;  %v2384_v29 = vld [vmem:[%s3568_s23 + $0x50] sm:$0xf] }
  0x9d   : > { %v3671_v22 = vor.u32 %v2681_v19, %v2378_v20  ;;  %v2720_v24 = vld [vmem:[%s3586_s14 + $0x78] sm:$0xff]  ;;  %v2710_v27 = vld [vmem:[%s3586_s14 + $0x28] sm:$0xff]  ;;  %v2683_v31 = vld [vmem:[%s3568_s23 + $0x54] sm:$0xf] }
  0x9e   : > { %2757 = vmatpush.bf16.msra.mxu2 %v2694_v5  ;;  %858 = vmatpush.bf16.msra.mxu0 %v2694_v5  ;;  %v2718_v28 = vld [vmem:[%s3586_s14 + $0x68] sm:$0xff]  ;;  %v2684_v30 = vld [vmem:[%s3568_s23 + $0x54] sm:$0xf0]  ;;  %v2386_v32 = vld [vmem:[%s3568_s23 + $0x58] sm:$0xf0] }
  0x9f   : > { %2765 = vmatpush.bf16.msra.mxu3 %v2702_v6  ;;  %907 = vmatpush.bf16.msra.mxu1 %v2702_v6  ;;  %v2709_v33 = vld [vmem:[%s3586_s14 + $0x20] sm:$0xff]  ;;  %v3687_v35 = vor.u32 %v2684_v30, %v2384_v29  ;;  %v3689_v36 = vor.u32 %v2683_v31, %v2386_v32  ;;  %v2708_v37 = vld [vmem:[%s3586_s14 + $0x18] sm:$0xff]  ;;  %v2707_v39 = vld [vmem:[%s3586_s14 + $0x10] sm:$0xff] }
  0xa0   : > { %v2717_v34 = vld [vmem:[%s3586_s14 + $0x60] sm:$0xff]  ;;  %v2716_v38 = vld [vmem:[%s3586_s14 + $0x58] sm:$0xff]  ;;  %v2715_v40 = vld [vmem:[%s3586_s14 + $0x50] sm:$0xff]  ;;  %p2662_p10 = scmp.ne.s32.totalorder %s4443_s27, 1 }
  0xa1   : > { %v2344_v41 = vld [vmem:[%s3568_s23] sm:$0xf]  ;;  %v2674_v42 = vld [vmem:[%s3568_s23 + $0x4] sm:$0xf0]  ;;  %v2685_v48 = vld [vmem:[%s3568_s23 + $0x64] sm:$0xf] }
  0xa2   : > { %2758 = vmatpush.bf16.msra.mxu2 %v2693_v7  ;;  %859 = vmatpush.bf16.msra.mxu0 %v2693_v7  ;;  %v3699_v43 = vor.u32 %v2674_v42, %v2344_v41  ;;  %v2706_v44 = vld [vmem:[%s3586_s14 + $0x8] sm:$0xff]  ;;  %v2392_v46 = vld [vmem:[%s3568_s23 + $0x60] sm:$0xf]  ;;  %v2673_v54 = vld [vmem:[%s3568_s23 + $0x4] sm:$0xf] }
  0xa3   : > { %2766 = vmatpush.bf16.msra.mxu3 %v2701_v8  ;;  %908 = vmatpush.bf16.msra.mxu1 %v2701_v8  ;;  %v2714_v45 = vld [vmem:[%s3586_s14 + $0x48] sm:$0xff]  ;;  %v2705_v50 = vld [vmem:[%s3586_s14] sm:$0xff]  ;;  %v2676_v58 = vld [vmem:[%s3568_s23 + $0x14] sm:$0xf0] }
  0xa4   : > { %v2686_v47 = vld [vmem:[%s3568_s23 + $0x64] sm:$0xf0]  ;;  %v2394_v49 = vld [vmem:[%s3568_s23 + $0x68] sm:$0xf0]  ;;  %v2352_v57 = vld [vmem:[%s3568_s23 + $0x10] sm:$0xf] }
  0xa5   : > { %v2713_v51 = vld [vmem:[%s3586_s14 + $0x40] sm:$0xff]  ;;  %v3710_v52 = vor.u32 %v2686_v47, %v2392_v46  ;;  %v3712_v53 = vor.u32 %v2685_v48, %v2394_v49  ;;  %v2346_v55 = vld [vmem:[%s3568_s23 + $0x8] sm:$0xf0]  ;;  %v3723_v59 = vor.u32 %v2676_v58, %v2352_v57  ;;  %v2400_v60 = vld [vmem:[%s3568_s23 + $0x70] sm:$0xf]  ;;  %s4444_s14 = sld [smem:[#allocation41_spill]] (!%p2662_p10) }
  0xa6   : > { %2759 = vmatpush.bf16.msra.mxu2 %v2692_v9  ;;  %860 = vmatpush.bf16.msra.mxu0 %v2692_v9  ;;  %v3716_v56 = vor.u32 %v2673_v54, %v2346_v55  ;;  %v2688_v61 = vld [vmem:[%s3568_s23 + $0x74] sm:$0xf0]  ;;  %v2687_v62 = vld [vmem:[%s3568_s23 + $0x74] sm:$0xf]  ;;  %v2402_v63 = vld [vmem:[%s3568_s23 + $0x78] sm:$0xf0] }
  0xa7   : > { %2767 = vmatpush.bf16.msra.mxu3 %v2700_v10  ;;  %909 = vmatpush.bf16.msra.mxu1 %v2700_v10  ;;  %v3730_v0 = vor.u32 %v2688_v61, %v2400_v60  ;;  %v3732_v1 = vor.u32 %v2687_v62, %v2402_v63  ;;  %v2675_v2 = vld [vmem:[%s3568_s23 + $0x14] sm:$0xf]  ;;  %v2354_v3 = vld [vmem:[%s3568_s23 + $0x18] sm:$0xf0]  ;;  %v2360_v5 = vld [vmem:[%s3568_s23 + $0x20] sm:$0xf] }
  0xa8   : > { %v3736_v4 = vor.u32 %v2675_v2, %v2354_v3  ;;  %v2678_v6 = vld [vmem:[%s3568_s23 + $0x24] sm:$0xf0]  ;;  %v2677_v8 = vld [vmem:[%s3568_s23 + $0x24] sm:$0xf]  ;;  %v2362_v9 = vld [vmem:[%s3568_s23 + $0x28] sm:$0xf0] }
  0xa9   : > { %v3743_v7 = vor.u32 %v2678_v6, %v2360_v5  ;;  %v3748_v10 = vor.u32 %v2677_v8, %v2362_v9  ;;  %v3773_v17 = vld [vmem:[%s487_s28] ss:$0 sm:$0xff] }
  0xaa   : > { %2760 = vmatpush.bf16.msra.mxu2 %v2691_v11  ;;  %861 = vmatpush.bf16.msra.mxu0 %v2691_v11  ;;  %v2368_v11 = vld [vmem:[%s3568_s23 + $0x30] sm:$0xf]  ;;  %v3814_v47 = vld [vmem:[%s586_s11] ss:$0 sm:$0xff] }
  0xab   : > { %2768 = vmatpush.bf16.msra.mxu3 %v2699_v12  ;;  %910 = vmatpush.bf16.msra.mxu1 %v2699_v12  ;;  %v2680_v12 = vld [vmem:[%s3568_s23 + $0x34] sm:$0xf0] }
  0xae   : > { %2761 = vmatpush.bf16.msra.mxu2 %v2690_v13  ;;  %862 = vmatpush.bf16.msra.mxu0 %v2690_v13  ;;  %v3755_v13 = vor.u32 %v2680_v12, %v2368_v11 }
  0xaf   : > { %2769 = vmatpush.bf16.msra.mxu3 %v2698_v14  ;;  %911 = vmatpush.bf16.msra.mxu1 %v2698_v14  ;;  %v2679_v14 = vld [vmem:[%s3568_s23 + $0x34] sm:$0xf] }
  0xb2   : > { %2762 = vmatpush.bf16.msra.mxu2 %v2689_v15  ;;  %863 = vmatpush.bf16.msra.mxu0 %v2689_v15  ;;  %v2370_v15 = vld [vmem:[%s3568_s23 + $0x38] sm:$0xf0] }
  0xb3   : > { %2770 = vmatpush.bf16.msra.mxu3 %v2697_v16  ;;  %912 = vmatpush.bf16.msra.mxu1 %v2697_v16  ;;  %v3760_v16 = vor.u32 %v2679_v14, %v2370_v15 }
  0xb5   : > { %884 = vmatmul.bf16.vlgmr.msra.gmra.mxu2 %v3669_v21  ;;  %864 = vmatmul.bf16.vlgmr.msra.gmra.mxu0 %v3699_v43 }
  0xb6   : > { %933 = vmatmul.bf16.vlgmr.msra.gmra.mxu3 %v3671_v22  ;;  %1086 = vmatpush.bf16.msrb.mxu2 %v2712_v23 }
  0xb7   : > { %1135 = vmatpush.bf16.msrb.mxu3 %v2720_v24  ;;  %913 = vmatmul.bf16.vlgmr.msra.gmra.mxu1 %v3716_v56 }
  0xba   : > { %1087 = vmatpush.bf16.msrb.mxu2 %v2711_v25 }
  0xbb   : > { %1136 = vmatpush.bf16.msrb.mxu3 %v2719_v26 }
  0xbe   : > { %1088 = vmatpush.bf16.msrb.mxu2 %v2710_v27 }
  0xbf   : > { %1137 = vmatpush.bf16.msrb.mxu3 %v2718_v28 }
  0xc2   : > { %1089 = vmatpush.bf16.msrb.mxu2 %v2709_v33 }
  0xc3   : > { %1138 = vmatpush.bf16.msrb.mxu3 %v2717_v34 }
  0xc5   : > { %889 = vmatmul.bf16.gmra.mxu2 %v3687_v35  ;;  %869 = vmatmul.bf16.gmra.mxu0 %v3723_v59 }
  0xc6   : > { %938 = vmatmul.bf16.gmra.mxu3 %v3689_v36  ;;  %1090 = vmatpush.bf16.msrb.mxu2 %v2708_v37 }
  0xc7   : > { %1139 = vmatpush.bf16.msrb.mxu3 %v2716_v38  ;;  %918 = vmatmul.bf16.gmra.mxu1 %v3736_v4 }
  0xca   : > { %1091 = vmatpush.bf16.msrb.mxu2 %v2707_v39 }
  0xcb   : > { %1140 = vmatpush.bf16.msrb.mxu3 %v2715_v40 }
  0xce   : > { %1092 = vmatpush.bf16.msrb.mxu2 %v2706_v44 }
  0xcf   : > { %1141 = vmatpush.bf16.msrb.mxu3 %v2714_v45 }
  0xd2   : > { %1093 = vmatpush.bf16.msrb.mxu2 %v2705_v50 }
  0xd3   : > { %1142 = vmatpush.bf16.msrb.mxu3 %v2713_v51 }
  0xd5   : > { %894 = vmatmul.bf16.gmra.mxu2 %v3710_v52  ;;  %874 = vmatmul.bf16.gmra.mxu0 %v3743_v7 }
  0xd6   : > { %943 = vmatmul.bf16.gmra.mxu3 %v3712_v53 }
  0xd7   : > { %923 = vmatmul.bf16.gmra.mxu1 %v3748_v10 }
  0xe5   : > { %899 = vmatmul.bf16.gmra.mxu2 %v3730_v0  ;;  %879 = vmatmul.bf16.gmra.mxu0 %v3755_v13 }
  0xe6   : > { %948 = vmatmul.bf16.gmra.mxu3 %v3732_v1 }
  0xe7   : > { %928 = vmatmul.bf16.gmra.mxu1 %v3760_v16 }
  0xf5   : > { %1094 = vmatmul.bf16.vlgmr.msrb.gmra.mxu2 %v3699_v43 }
  0xf6   : > { %1143 = vmatmul.bf16.vlgmr.msrb.gmra.mxu3 %v3716_v56 }
 0x105   : > { %1099 = vmatmul.bf16.gmra.mxu2 %v3723_v59 }
 0x106   : > { %1148 = vmatmul.bf16.gmra.mxu3 %v3736_v4 }
 0x115   : > { %1104 = vmatmul.bf16.gmra.mxu2 %v3743_v7 }
 0x116   : > { %1153 = vmatmul.bf16.gmra.mxu3 %v3748_v10 }
 0x125   : > { %1109 = vmatmul.bf16.gmra.mxu2 %v3755_v13 }
 0x126   : > { %1158 = vmatmul.bf16.gmra.mxu3 %v3760_v16 }
 0x135   : > { %1114 = vmatmul.bf16.gmra.mxu2 %v3669_v21 }
 0x136   : > { %1163 = vmatmul.bf16.gmra.mxu3 %v3671_v22 }
 0x138   : > { %v885_v18 = vpop.f32.mrf.mxu2 }
 0x139   : > { %v934_v19 = vpop.f32.mrf.mxu3  ;;  %v886_v20 = vadd.f32 %v3773_v17, %v885_v18 }
 0x13b   : > { %v3776_v23 = vadd.f32 %v934_v19, %v886_v20 }
 0x140   : > { %v3778_v24 = vpop.f32.mrf.mxu2 }
 0x141   : > { %v3780_v25 = vpop.f32.mrf.mxu3 }
 0x145   : > { %1119 = vmatmul.bf16.gmra.mxu2 %v3687_v35 }
 0x146   : > { %1168 = vmatmul.bf16.gmra.mxu3 %v3689_v36 }
 0x148   : > { %v890_v26 = vpop.f32.mrf.mxu2 }
 0x149   : > { %v939_v27 = vpop.f32.mrf.mxu3  ;;  %v891_v28 = vadd.f32 %v3773_v17, %v890_v26 }
 0x14b   : > { %v3785_v29 = vadd.f32 %v939_v27, %v891_v28 }
 0x150   : > { %v3787_v30 = vpop.f32.mrf.mxu2 }
 0x151   : > { %v3789_v31 = vpop.f32.mrf.mxu3 }
 0x155   : > { %1124 = vmatmul.bf16.gmra.mxu2 %v3710_v52 }
 0x156   : > { %1173 = vmatmul.bf16.gmra.mxu3 %v3712_v53 }
 0x158   : > { %v895_v32 = vpop.f32.mrf.mxu2 }
 0x159   : > { %v944_v33 = vpop.f32.mrf.mxu3  ;;  %v896_v34 = vadd.f32 %v3773_v17, %v895_v32 }
 0x15b   : > { %v3794_v37 = vadd.f32 %v944_v33, %v896_v34 }
 0x160   : > { %v3796_v38 = vpop.f32.mrf.mxu2 }
 0x161   : > { %v3798_v39 = vpop.f32.mrf.mxu3 }
 0x165   : > { %1129 = vmatmul.bf16.gmra.mxu2 %v3730_v0 }
 0x166   : > { %1178 = vmatmul.bf16.gmra.mxu3 %v3732_v1 }
 0x168   : > { %v900_v40 = vpop.f32.mrf.mxu2 }
 0x169   : > { %v949_v41 = vpop.f32.mrf.mxu3  ;;  %v901_v42 = vadd.f32 %v3773_v17, %v900_v40 }
 0x16b   : > { %v3803_v44 = vadd.f32 %v949_v41, %v901_v42 }
 0x16d   : > { %4434 = vst [vmem:[#allocation31_spill] sm:$0xff] %v3803_v44 }
 0x170   : > { %v3805_v45 = vpop.f32.mrf.mxu2 }
 0x171   : > { %4435 = vst [vmem:[#allocation32_spill] sm:$0xff] %v3805_v45  ;;  %v3807_v46 = vpop.f32.mrf.mxu3  ;;  %v2725_v45 = vld [vmem:[%s3592_s6 + $0x20] sm:$0xff] }
 0x172   : > { %4436 = vst [vmem:[#allocation33_spill] sm:$0xff] %v3807_v46 }
 0x178   : > { %v1095_v48 = vpop.f32.mrf.mxu2 }
 0x179   : > { %v1144_v49 = vpop.f32.mrf.mxu3  ;;  %v1096_v50 = vadd.f32 %v3814_v47, %v1095_v48 }
 0x17b   : > { %v3817_v51 = vadd.f32 %v1144_v49, %v1096_v50 }
 0x180   : > { %v3819_v54 = vpop.f32.mrf.mxu2 }
 0x181   : > { %v3821_v55 = vpop.f32.mrf.mxu3 }
 0x188   : > { %v1100_v57 = vpop.f32.mrf.mxu2 }
 0x189   : > { %v1149_v58 = vpop.f32.mrf.mxu3  ;;  %v1101_v60 = vadd.f32 %v3814_v47, %v1100_v57 }
 0x18b   : > { %v3824_v61 = vadd.f32 %v1149_v58, %v1101_v60 }
 0x190   : > { %v3826_v62 = vpop.f32.mrf.mxu2 }
 0x191   : > { %v3828_v63 = vpop.f32.mrf.mxu3 }
 0x198   : > { %v1105_v2 = vpop.f32.mrf.mxu2 }
 0x199   : > { %v1154_v3 = vpop.f32.mrf.mxu3  ;;  %v1106_v5 = vadd.f32 %v3814_v47, %v1105_v2 }
 0x19b   : > { %v3831_v6 = vadd.f32 %v1154_v3, %v1106_v5 }
 0x1a0   : > { %v3833_v8 = vpop.f32.mrf.mxu2 }
 0x1a1   : > { %v3835_v9 = vpop.f32.mrf.mxu3 }
 0x1a8   : > { %v1110_v11 = vpop.f32.mrf.mxu2 }
 0x1a9   : > { %v1159_v12 = vpop.f32.mrf.mxu3  ;;  %v1111_v14 = vadd.f32 %v3814_v47, %v1110_v11 }
 0x1ab   : > { %v3838_v15 = vadd.f32 %v1159_v12, %v1111_v14  ;;  %v2728_v12 = vld [vmem:[%s3592_s6 + $0x38] sm:$0xff] }
 0x1ac   : > { %v2736_v14 = vld [vmem:[%s3592_s6 + $0x78] sm:$0xff]  ;;  %1316 = vmatpush.bf16.msrb.mxu0 %v2728_v12  ;;  %v2734_v12 = vld [vmem:[%s3592_s6 + $0x68] sm:$0xff] }
 0x1ad   : > { %1365 = vmatpush.bf16.msrb.mxu1 %v2736_v14 }
 0x1b0   : > { %v3840_v18 = vpop.f32.mrf.mxu2 }
 0x1b1   : > { %v3842_v19 = vpop.f32.mrf.mxu3 }
 0x1b8   : > { %v1115_v20 = vpop.f32.mrf.mxu2 }
 0x1b9   : > { %v1164_v26 = vpop.f32.mrf.mxu3  ;;  %v1116_v27 = vadd.f32 %v3814_v47, %v1115_v20 }
 0x1bb   : > { %v3845_v28 = vadd.f32 %v1164_v26, %v1116_v27  ;;  %v2727_v27 = vld [vmem:[%s3592_s6 + $0x30] sm:$0xff] }
 0x1bc   : > { %1317 = vmatpush.bf16.msrb.mxu0 %v2727_v27  ;;  %v2731_v27 = vld [vmem:[%s3592_s6 + $0x50] sm:$0xff] }
 0x1c0   : > { %v1117_v32 = vpop.f32.mrf.mxu2 }
 0x1c1   : > { %v1166_v33 = vpop.f32.mrf.mxu3  ;;  %v1118_v34 = vadd.f32 %v3814_v47, %v1117_v32  ;;  %v2735_v32 = vld [vmem:[%s3592_s6 + $0x70] sm:$0xff] }
 0x1c2   : > { %1366 = vmatpush.bf16.msrb.mxu1 %v2735_v32 }
 0x1c3   : > { %v3848_v40 = vadd.f32 %v1166_v33, %v1118_v34 }
 0x1c6   : > { %1367 = vmatpush.bf16.msrb.mxu1 %v2734_v12 }
 0x1c8   : > { %v1120_v42 = vpop.f32.mrf.mxu2 }
 0x1c9   : > { %v1169_v48 = vpop.f32.mrf.mxu3 }
 0x1d0   : > { %v1122_v49 = vpop.f32.mrf.mxu2 }
 0x1d1   : > { %v1171_v50 = vpop.f32.mrf.mxu3 }
 0x1d8   : > { %v1125_v57 = vpop.f32.mrf.mxu2 }
 0x1d9   : > { %v1174_v58 = vpop.f32.mrf.mxu3 }
 0x1e0   : > { %v1127_v60 = vpop.f32.mrf.mxu2 }
 0x1e1   : > { %v1176_v2 = vpop.f32.mrf.mxu3  ;;  %v1128_v44 = vadd.f32 %v3814_v47, %v1127_v60  ;;  %v1123_v60 = vadd.f32 %v3814_v47, %v1122_v49  ;;  %v2730_v49 = vld [vmem:[%s3592_s6 + $0x48] sm:$0xff] }
 0x1e3   : > { %v1177_v14 = vadd.f32 %v1176_v2, %v1128_v44  ;;  %v2732_v44 = vld [vmem:[%s3592_s6 + $0x58] sm:$0xff]  ;;  %v1172_v2 = vadd.f32 %v1171_v50, %v1123_v60  ;;  %v4438_v50 = vpack.c.bf16 %v3848_v40, %v3845_v28  ;;  %v1103_v28 = vadd.f32 %v3814_v47, %v3826_v62 }
 0x1e8   : > { %v1130_v3 = vpop.f32.mrf.mxu2 }
 0x1e9   : > { %v1179_v5 = vpop.f32.mrf.mxu3  ;;  %v1131_v11 = vadd.f32 %v3814_v47, %v1130_v3  ;;  %v1126_v3 = vadd.f32 %v3814_v47, %v1125_v57  ;;  %v2724_v57 = vld [vmem:[%s3592_s6 + $0x18] sm:$0xff] }
 0x1eb   : > { %v1180_v34 = vadd.f32 %v1179_v5, %v1131_v11  ;;  %v2733_v5 = vld [vmem:[%s3592_s6 + $0x60] sm:$0xff]  ;;  %v1175_v11 = vadd.f32 %v1174_v58, %v1126_v3  ;;  %v865_v3 = vpop.f32.mrf.mxu0 }
 0x1ec   : > { %1368 = vmatpush.bf16.msrb.mxu1 %v2733_v5 }
 0x1f0   : > { %v1132_v20 = vpop.f32.mrf.mxu2  ;;  %1369 = vmatpush.bf16.msrb.mxu1 %v2732_v44 }
 0x1f1   : > { %v1133_v26 = vadd.f32 %v3814_v47, %v1132_v20  ;;  %v1181_v33 = vpop.f32.mrf.mxu3  ;;  %v2726_v20 = vld [vmem:[%s3592_s6 + $0x28] sm:$0xff] }
 0x1f2   : > { %1318 = vmatpush.bf16.msrb.mxu0 %v2726_v20  ;;  %v1108_v20 = vadd.f32 %v3814_v47, %v3833_v8 }
 0x1f3   : > { %v1182_v41 = vadd.f32 %v1181_v33, %v1133_v26  ;;  %v2723_v26 = vld [vmem:[%s3592_s6 + $0x10] sm:$0xff]  ;;  %v2729_v33 = vld [vmem:[%s3592_s6 + $0x40] sm:$0xff] }
 0x1f4   : > { %1370 = vmatpush.bf16.msrb.mxu1 %v2731_v27 }
 0x1f5   : > { %v1429_v46 = vpack.c.bf16 %v1182_v41, %v1180_v34  ;;  %v1428_v41 = vpack.c.bf16 %v1177_v14, %v1175_v11  ;;  %v1113_v34 = vadd.f32 %v3814_v47, %v3840_v18  ;;  %v914_v18 = vpop.f32.mrf.mxu1  ;;  %v1157_v14 = vadd.f32 %v3835_v9, %v1108_v20 }
 0x1f6   : > { %1319 = vmatpush.bf16.msrb.mxu0 %v2725_v45  ;;  %v2722_v45 = vld [vmem:[%s3592_s6 + $0x8] sm:$0xff] }
 0x1f7   : > { %1438 = vmatpush.bf16.xpose.msra.mxu2 %v1429_v46  ;;  %v1121_v46 = vadd.f32 %v3814_v47, %v1120_v42  ;;  %v2721_v42 = vld [vmem:[%s3592_s6] sm:$0xff]  ;;  %v1424_v40 = vpack.c.bf16 %v1157_v14, %v3831_v6  ;;  %v866_v6 = vadd.f32 %v3773_v17, %v865_v3 }
 0x1f8   : > { %1371 = vmatpush.bf16.msrb.mxu1 %v2730_v49 }
 0x1f9   : > { %v1170_v58 = vadd.f32 %v1169_v48, %v1121_v46  ;;  %v1162_v48 = vadd.f32 %v3842_v19, %v1113_v34 }
 0x1fa   : > { %1320 = vmatpush.bf16.msrb.mxu0 %v2724_v57 }
 0x1fb   : > { %v1427_v32 = vpack.c.bf16 %v1172_v2, %v1170_v58  ;;  %v1425_v12 = vpack.c.bf16 %v1162_v48, %v3838_v15  ;;  %v1098_v15 = vadd.f32 %v3814_v47, %v3819_v54 }
 0x1fc   : > { %1372 = vmatpush.bf16.msrb.mxu1 %v2729_v33 }
 0x1fd   : > { %v916_v8 = vpop.f32.mrf.mxu1  ;;  %v1147_v62 = vadd.f32 %v3821_v55, %v1098_v15 }
 0x1fe   : > { %1321 = vmatpush.bf16.msrb.mxu0 %v2723_v26 }
 0x1ff   : > { %1439 = vmatpush.bf16.xpose.msra.mxu2 %v1428_v41  ;;  %1373 = vmatmul.bf16.vlgmr.msrb.gmra.mxu1 %v3716_v56  ;;  %v1152_v56 = vadd.f32 %v3828_v63, %v1103_v28 }
 0x201   : > { %v1423_v19 = vpack.c.bf16 %v1152_v56, %v3824_v61 }
 0x202   : > { %1322 = vmatpush.bf16.msrb.mxu0 %v2722_v45 }
 0x205   : > { %v919_v5 = vpop.f32.mrf.mxu1 }
 0x206   : > { %1323 = vmatpush.bf16.msrb.mxu0 %v2721_v42 }
 0x207   : > { %1440 = vmatpush.bf16.xpose.msra.mxu2 %v1427_v32 }
 0x209   : > { %1324 = vmatmul.bf16.vlgmr.msrb.gmra.mxu0 %v3699_v43  ;;  %v867_v43 = vpop.f32.mrf.mxu0 }
 0x20a   : > { %v868_v11 = vadd.f32 %v3773_v17, %v867_v43 }
 0x20c   : > { %v917_v63 = vadd.f32 %v916_v8, %v868_v11 }
 0x20d   : > { %v921_v61 = vpop.f32.mrf.mxu1 }
 0x20f   : > { %1441 = vmatpush.bf16.xpose.msra.mxu2 %v4438_v50  ;;  %1378 = vmatmul.bf16.gmra.mxu1 %v3736_v4  ;;  %v915_v4 = vadd.f32 %v914_v18, %v866_v6 }
 0x211   : > { %v870_v9 = vpop.f32.mrf.mxu0  ;;  %v1414_v54 = vpack.c.bf16 %v917_v63, %v915_v4 }
 0x212   : > { %v871_v55 = vadd.f32 %v3773_v17, %v870_v9 }
 0x214   : > { %v920_v57 = vadd.f32 %v919_v5, %v871_v55 }
 0x215   : > { %v924_v46 = vpop.f32.mrf.mxu1 }
 0x217   : > { %1442 = vmatpush.bf16.xpose.msra.mxu2 %v1425_v12 }
 0x219   : > { %1329 = vmatmul.bf16.gmra.mxu0 %v3723_v59  ;;  %v1422_v59 = vpack.c.bf16 %v1147_v62, %v3817_v51  ;;  %v872_v47 = vpop.f32.mrf.mxu0 }
 0x21a   : > { %v873_v41 = vadd.f32 %v3773_v17, %v872_v47 }
 0x21c   : > { %v922_v44 = vadd.f32 %v921_v61, %v873_v41 }
 0x21e   : > { %v1415_v51 = vpack.c.bf16 %v922_v44, %v920_v57 }
 0x21f   : > { %1443 = vmatpush.bf16.xpose.msra.mxu2 %v1424_v40  ;;  %1383 = vmatmul.bf16.gmra.mxu1 %v3748_v10  ;;  %v926_v10 = vpop.f32.mrf.mxu1  ;;  %v4441_v40 = vld [vmem:[#allocation33_spill] sm:$0xff] }
 0x221   : > { %v875_v60 = vpop.f32.mrf.mxu0 }
 0x222   : > { %v876_v2 = vadd.f32 %v3773_v17, %v875_v60 }
 0x224   : > { %v925_v58 = vadd.f32 %v924_v46, %v876_v2 }
 0x227   : > { %1444 = vmatpush.bf16.xpose.msra.mxu2 %v1423_v19  ;;  %v929_v45 = vpop.f32.mrf.mxu1 }
 0x229   : > { %1334 = vmatmul.bf16.gmra.mxu0 %v3743_v7  ;;  %v877_v7 = vpop.f32.mrf.mxu0 }
 0x22a   : > { %v878_v26 = vadd.f32 %v3773_v17, %v877_v7 }
 0x22c   : > { %v927_v32 = vadd.f32 %v926_v10, %v878_v26 }
 0x22e   : > { %v1416_v49 = vpack.c.bf16 %v927_v32, %v925_v58 }
 0x22f   : > { %1445 = vmatpush.bf16.xpose.msra.mxu2 %v1422_v59  ;;  %1388 = vmatmul.bf16.gmra.mxu1 %v3760_v16  ;;  %v931_v33 = vpop.f32.mrf.mxu1 }
 0x231   : > { %v880_v27 = vpop.f32.mrf.mxu0 }
 0x232   : > { %v881_v16 = vadd.f32 %v3773_v17, %v880_v27 }
 0x234   : > { %v930_v34 = vadd.f32 %v929_v45, %v881_v16 }
 0x236   : > { %1446 = vmatmul.bf16.vlgmr.msra.gmra.mxu2 %v1414_v54 }
 0x239   : > { %1339 = vmatmul.bf16.gmra.mxu0 %v3755_v13  ;;  %v882_v13 = vpop.f32.mrf.mxu0 }
 0x23a   : > { %v883_v42 = vadd.f32 %v3773_v17, %v882_v13 }
 0x23c   : > { %v932_v50 = vadd.f32 %v931_v33, %v883_v42 }
 0x23e   : > { %v1417_v48 = vpack.c.bf16 %v932_v50, %v930_v34 }
 0x23f   : > { %1393 = vmatmul.bf16.gmra.mxu1 %v3671_v22 }
 0x246   : > { %1451 = vmatmul.bf16.gmra.mxu2 %v1415_v51 }
 0x249   : > { %1344 = vmatmul.bf16.gmra.mxu0 %v3669_v21  ;;  %v888_v21 = vadd.f32 %v3773_v17, %v3778_v24 }
 0x24b   : > { %v937_v22 = vadd.f32 %v3780_v25, %v888_v21 }
 0x24d   : > { %v1418_v3 = vpack.c.bf16 %v937_v22, %v3776_v23 }
 0x24f   : > { %1398 = vmatmul.bf16.gmra.mxu1 %v3689_v36 }
 0x256   : > { %1456 = vmatmul.bf16.gmra.mxu2 %v1416_v49 }
 0x259   : > { %1349 = vmatmul.bf16.gmra.mxu0 %v3687_v35  ;;  %v893_v35 = vadd.f32 %v3773_v17, %v3787_v30 }
 0x25b   : > { %v942_v36 = vadd.f32 %v3789_v31, %v893_v35 }
 0x25d   : > { %v1419_v24 = vpack.c.bf16 %v942_v36, %v3785_v29 }
 0x25f   : > { %1403 = vmatmul.bf16.gmra.mxu1 %v3712_v53  ;;  %v3932_v53 = vld [vmem:[%s589_s2] ss:$0 sm:$0xff] }
 0x266   : > { %1461 = vmatmul.bf16.gmra.mxu2 %v1417_v48 }
 0x269   : > { %1354 = vmatmul.bf16.gmra.mxu0 %v3710_v52  ;;  %v898_v52 = vadd.f32 %v3773_v17, %v3796_v38  ;;  %v4440_v38 = vld [vmem:[#allocation32_spill] sm:$0xff] }
 0x26a   : > { %v903_v12 = vadd.f32 %v3773_v17, %v4440_v38 }
 0x26c   : > { %v952_v43 = vadd.f32 %v4441_v40, %v903_v12 }
 0x26f   : > { %1408 = vmatmul.bf16.gmra.mxu1 %v3732_v1 }
 0x276   : > { %1466 = vmatmul.bf16.gmra.mxu2 %v1418_v3 }
 0x279   : > { %1359 = vmatmul.bf16.gmra.mxu0 %v3730_v0  ;;  %v947_v0 = vadd.f32 %v3798_v39, %v898_v52  ;;  %v4442_v39 = vld [vmem:[#allocation31_spill] sm:$0xff] }
 0x27a   : > { %v1421_v8 = vpack.c.bf16 %v952_v43, %v4442_v39 }
 0x27b   : > { %v1420_v1 = vpack.c.bf16 %v947_v0, %v3794_v37 }
 0x27c   : > { %v1374_v25 = vpop.f32.mrf.mxu1 }
 0x284   : > { %v3941_v20 = vpop.f32.mrf.mxu1 }
 0x286   : > { %1471 = vmatmul.bf16.gmra.mxu2 %v1419_v24  ;;  %v1325_v23 = vpop.f32.mrf.mxu0 }
 0x287   : > { %v1326_v30 = vadd.f32 %v3932_v53, %v1325_v23 }
 0x289   : > { %v3936_v31 = vadd.f32 %v1374_v25, %v1326_v30 }
 0x28c   : > { %v1379_v14 = vpop.f32.mrf.mxu1 }
 0x28e   : > { %v3939_v29 = vpop.f32.mrf.mxu0 }
 0x294   : > { %v3952_v37 = vpop.f32.mrf.mxu1 }
 0x296   : > { %1476 = vmatmul.bf16.gmra.mxu2 %v1420_v1  ;;  %v1330_v18 = vpop.f32.mrf.mxu0 }
 0x297   : > { %v1331_v28 = vadd.f32 %v3932_v53, %v1330_v18 }
 0x299   : > { %v3947_v56 = vadd.f32 %v1379_v14, %v1331_v28 }
 0x29c   : > { %v1384_v9 = vpop.f32.mrf.mxu1 }
 0x29e   : > { %v3950_v15 = vpop.f32.mrf.mxu0 }
 0x2a4   : > { %v3959_v6 = vpop.f32.mrf.mxu1 }
 0x2a6   : > { %1481 = vmatmul.bf16.gmra.mxu2 %v1421_v8  ;;  %v1335_v19 = vpop.f32.mrf.mxu0 }
 0x2a7   : > { %v1336_v62 = vadd.f32 %v3932_v53, %v1335_v19 }
 0x2a9   : > { %v3955_v17 = vadd.f32 %v1384_v9, %v1336_v62 }
 0x2ac   : > { %v1389_v4 = vpop.f32.mrf.mxu1 }
 0x2ae   : > { %v3957_v5 = vpop.f32.mrf.mxu0 }
 0x2af   : > { %v1338_v19 = vadd.f32 %v3932_v53, %v3957_v5 }
 0x2b4   : > { %v1391_v60 = vpop.f32.mrf.mxu1 }
 0x2b6   : > { %v1340_v59 = vpop.f32.mrf.mxu0 }
 0x2b7   : > { %v1341_v63 = vadd.f32 %v3932_v53, %v1340_v59  ;;  %v1333_v59 = vadd.f32 %v3932_v53, %v3950_v15 }
 0x2b9   : > { %v3961_v11 = vpop.f32.mrf.mxu2  ;;  %v3965_v47 = vadd.f32 %v1389_v4, %v1341_v63  ;;  %v1387_v4 = vadd.f32 %v3959_v6, %v1338_v19 }
 0x2ba   : > { %1487 = vmax.xlane.f32.xlu0 %v3961_v11 }
 0x2bc   : > { %v1394_v46 = vpop.f32.mrf.mxu1 }
 0x2be   : > { %v1342_v61 = vpop.f32.mrf.mxu0 }
 0x2bf   : > { %v1343_v43 = vadd.f32 %v3932_v53, %v1342_v61  ;;  %v1328_v61 = vadd.f32 %v3932_v53, %v3939_v29 }
 0x2c1   : > { %v3967_v54 = vpop.f32.mrf.mxu2  ;;  %v1392_v9 = vadd.f32 %v1391_v60, %v1343_v43  ;;  %v1377_v5 = vadd.f32 %v3941_v20, %v1328_v61 }
 0x2c2   : > { %1489 = vmax.xlane.f32.xlu0 %v3967_v54 }
 0x2c3   : > { %v1433_v63 = vpack.c.bf16 %v1392_v9, %v3965_v47  ;;  %v1430_v15 = vpack.c.bf16 %v1377_v5, %v3936_v31 }
 0x2c4   : > { %v1396_v10 = vpop.f32.mrf.mxu1 }
 0x2c6   : > { %v1345_v41 = vpop.f32.mrf.mxu0 }
 0x2c7   : > { %v1346_v57 = vadd.f32 %v3932_v53, %v1345_v41  ;;  %v1382_v41 = vadd.f32 %v3952_v37, %v1333_v59 }
 0x2c9   : > { %v3970_v55 = vpop.f32.mrf.mxu2  ;;  %v1395_v44 = vadd.f32 %v1394_v46, %v1346_v57  ;;  %v1432_v46 = vpack.c.bf16 %v1387_v4, %v3955_v17  ;;  %v1431_v60 = vpack.c.bf16 %v1382_v41, %v3947_v56 }
 0x2ca   : > { %1491 = vmax.xlane.f32.xlu1 %v3970_v55 }
 0x2cc   : > { %v1399_v27 = vpop.f32.mrf.mxu1 }
 0x2ce   : > { %v1347_v7 = vpop.f32.mrf.mxu0 }
 0x2cf   : > { %v1348_v18 = vadd.f32 %v3932_v53, %v1347_v7 }
 0x2d1   : > { %v3974_v51 = vpop.f32.mrf.mxu2  ;;  %v1397_v39 = vadd.f32 %v1396_v10, %v1348_v18 }
 0x2d2   : > { %1493 = vmax.xlane.f32.xlu1 %v3974_v51 }
 0x2d3   : > { %v1434_v62 = vpack.c.bf16 %v1397_v39, %v1395_v44 }
 0x2d4   : > { %v1401_v45 = vpop.f32.mrf.mxu1 }
 0x2d6   : > { %v1350_v26 = vpop.f32.mrf.mxu0 }
 0x2d7   : > { %v1351_v25 = vadd.f32 %v3932_v53, %v1350_v26 }
 0x2d9   : > { %v3977_v2 = vpop.f32.mrf.mxu2  ;;  %v1400_v14 = vadd.f32 %v1399_v27, %v1351_v25 }
 0x2da   : > { %1495 = vmax.xlane.f32.xlu2 %v3977_v2 }
 0x2dc   : > { %v1404_v16 = vpop.f32.mrf.mxu1 }
 0x2de   : > { %v1352_v32 = vpop.f32.mrf.mxu0 }
 0x2df   : > { %v1353_v30 = vadd.f32 %v3932_v53, %v1352_v32 }
 0x2e1   : > { %v3980_v58 = vpop.f32.mrf.mxu2  ;;  %v1402_v28 = vadd.f32 %v1401_v45, %v1353_v30 }
 0x2e2   : > { %1497 = vmax.xlane.f32.xlu2 %v3980_v58 }
 0x2e3   : > { %v1435_v8 = vpack.c.bf16 %v1402_v28, %v1400_v14 }
 0x2e4   : > { %v1406_v34 = vpop.f32.mrf.mxu1 }
 0x2e6   : > { %v1355_v13 = vpop.f32.mrf.mxu0 }
 0x2e7   : > { %v1356_v3 = vadd.f32 %v3932_v53, %v1355_v13 }
 0x2e9   : > { %v3983_v49 = vpop.f32.mrf.mxu2  ;;  %v1405_v0 = vadd.f32 %v1404_v16, %v1356_v3 }
 0x2ea   : > { %1499 = vmax.xlane.f32.xlu0 %v3983_v49 }
 0x2ec   : > { %v1409_v21 = vpop.f32.mrf.mxu1 }
 0x2ee   : > { %v1357_v33 = vpop.f32.mrf.mxu0 }
 0x2ef   : > { %v1358_v35 = vadd.f32 %v3932_v53, %v1357_v33 }
 0x2f1   : > { %v3986_v42 = vpop.f32.mrf.mxu2  ;;  %v1407_v1 = vadd.f32 %v1406_v34, %v1358_v35 }
 0x2f2   : > { %1501 = vmax.xlane.f32.xlu1 %v3986_v42 }
 0x2f3   : > { %v1436_v40 = vpack.c.bf16 %v1407_v1, %v1405_v0 }
 0x2f4   : > { %v1411_v24 = vpop.f32.mrf.mxu1 }
 0x2f6   : > { %v1360_v48 = vpop.f32.mrf.mxu0 }
 0x2f7   : > { %v1361_v22 = vadd.f32 %v3932_v53, %v1360_v48 }
 0x2f9   : > { %v3989_v50 = vpop.f32.mrf.mxu2  ;;  %v1410_v52 = vadd.f32 %v1409_v21, %v1361_v22 }
 0x2fa   : > { %1503 = vmax.xlane.f32.xlu1 %v3989_v50 }
 0x2fe   : > { %v1362_v36 = vpop.f32.mrf.mxu0 }
 0x2ff   : > { %v1363_v23 = vadd.f32 %v3932_v53, %v1362_v36 }
 0x301   : > { %v1412_v38 = vadd.f32 %v1411_v24, %v1363_v23  ;;  %v4014_v53 = vpop.f32.mrf.mxu2 }
 0x303   : > { %v1437_v12 = vpack.c.bf16 %v1412_v38, %v1410_v52 }
 0x305   : > { %1639 = vmatpush.bf16.msra.mxu3 %v1437_v12 }
 0x309   : > { %1640 = vmatpush.bf16.msra.mxu3 %v1436_v40  ;;  %v4020_v31 = vpop.f32.mrf.mxu2 }
 0x30d   : > { %1641 = vmatpush.bf16.msra.mxu3 %v1435_v8 }
 0x311   : > { %1642 = vmatpush.bf16.msra.mxu3 %v1434_v62  ;;  %v4030_v27 = vpop.f32.mrf.mxu2 }
 0x315   : > { %1643 = vmatpush.bf16.msra.mxu3 %v1433_v63 }
 0x319   : > { %1644 = vmatpush.bf16.msra.mxu3 %v1432_v46 }
 0x31d   : > { %1645 = vmatpush.bf16.msra.mxu3 %v1431_v60 }
 0x321   : > { %1646 = vmatpush.bf16.msra.mxu3 %v1430_v15 }
 0x32d   : > { %v1488_v6 = vpop.xlane.xlu0 %1487 }
 0x32e   : > { %v1519_v47 = vsub.f32 %v3961_v11, %v1488_v6 }
 0x330   : > { %v1535_v57 = vmul.f32 1.442695, %v1519_v47 }
 0x332   : > { %2908 = vpow2.f32 %v1535_v57 }
 0x335   : > { %v1490_v29 = vpop.xlane.xlu0 %1489 }
 0x336   : > { %v1520_v37 = vsub.f32 %v3967_v54, %v1490_v29 }
 0x338   : > { %v4017_v17 = vpop.eup %2908  ;;  %v1537_v20 = vmul.f32 1.442695, %v1520_v37 }
 0x339   : > { %1567 = vadd.xlane.f32.xlu2 %v4017_v17 }
 0x33a   : > { %2910 = vpow2.f32 %v1537_v20 }
 0x33d   : > { %v1492_v56 = vpop.xlane.xlu1 %1491 }
 0x33e   : > { %v1521_v44 = vsub.f32 %v3970_v55, %v1492_v56 }
 0x340   : > { %v4023_v7 = vpop.eup %2910  ;;  %v1539_v11 = vmul.f32 1.442695, %v1521_v44  ;;  %v2752_v44 = vld [vmem:[%s3595_s18 + $0x74] sm:$0xf0] }
 0x341   : > { %1569 = vadd.xlane.f32.xlu0 %v4023_v7  ;;  %1505 = vmax.xlane.f32.xlu2 %v4014_v53 }
 0x342   : > { %2912 = vpow2.f32 %v1539_v11 }
 0x345   : > { %v1494_v54 = vpop.xlane.xlu1 %1493 }
 0x346   : > { %v1522_v10 = vsub.f32 %v3974_v51, %v1494_v54  ;;  %v4039_v51 = vpop.f32.mrf.mxu2  ;;  %v2658_v54 = vld [vmem:[%s3595_s18 + $0x78] sm:$0xf0] }
 0x348   : > { %v4028_v26 = vpop.eup %2912  ;;  %v1541_v32 = vmul.f32 1.442695, %v1522_v10  ;;  %v2648_v10 = vld [vmem:[%s3595_s18 + $0x60] sm:$0xf] }
 0x349   : > { %1571 = vadd.xlane.f32.xlu0 %v4028_v26  ;;  %1507 = vmax.xlane.f32.xlu2 %v4020_v31 }
 0x34a   : > { %2914 = vpow2.f32 %v1541_v32  ;;  %v2749_v32 = vld [vmem:[%s3595_s18 + $0x64] sm:$0xf] }
 0x34d   : > { %v1496_v55 = vpop.xlane.xlu2 %1495 }
 0x34e   : > { %v1523_v45 = vsub.f32 %v3977_v2, %v1496_v55  ;;  %v4046_v2 = vpop.f32.mrf.mxu2  ;;  %v2650_v55 = vld [vmem:[%s3595_s18 + $0x68] sm:$0xf0] }
 0x350   : > { %v4035_v13 = vpop.eup %2914  ;;  %v1543_v16 = vmul.f32 1.442695, %v1523_v45 }
 0x351   : > { %1573 = vadd.xlane.f32.xlu1 %v4035_v13  ;;  %1509 = vmax.xlane.f32.xlu0 %v4030_v27 }
 0x352   : > { %2916 = vpow2.f32 %v1543_v16 }
 0x355   : > { %v1498_v33 = vpop.xlane.xlu2 %1497 }
 0x356   : > { %v1524_v34 = vsub.f32 %v3980_v58, %v1498_v33  ;;  %v4053_v24 = vpop.f32.mrf.mxu2 }
 0x358   : > { %v4042_v48 = vpop.eup %2916  ;;  %v1545_v21 = vmul.f32 1.442695, %v1524_v34 }
 0x359   : > { %1575 = vadd.xlane.f32.xlu1 %v4042_v48  ;;  %1511 = vmax.xlane.f32.xlu0 %v4039_v51 }
 0x35a   : > { %2918 = vpow2.f32 %v1545_v21 }
 0x35d   : > { %v1500_v22 = vpop.xlane.xlu0 %1499 }
 0x35e   : > { %v1525_v3 = vsub.f32 %v3983_v49, %v1500_v22  ;;  %v4063_v1 = vpop.f32.mrf.mxu2 }
 0x360   : > { %v4049_v35 = vpop.eup %2918  ;;  %v1547_v36 = vmul.f32 1.442695, %v1525_v3 }
 0x361   : > { %1577 = vadd.xlane.f32.xlu2 %v4049_v35  ;;  %1513 = vmax.xlane.f32.xlu1 %v4046_v2 }
 0x362   : > { %2920 = vpow2.f32 %v1547_v36 }
 0x365   : > { %v1502_v58 = vpop.xlane.xlu1 %1501 }
 0x366   : > { %v1526_v52 = vsub.f32 %v3986_v42, %v1502_v58 }
 0x368   : > { %v4056_v23 = vpop.eup %2920  ;;  %v1549_v25 = vmul.f32 1.442695, %v1526_v52 }
 0x369   : > { %1579 = vadd.xlane.f32.xlu2 %v4056_v23  ;;  %1515 = vmax.xlane.f32.xlu1 %v4053_v24 }
 0x36a   : > { %2922 = vpow2.f32 %v1549_v25 }
 0x36d   : > { %v1504_v49 = vpop.xlane.xlu1 %1503 }
 0x36e   : > { %v1527_v30 = vsub.f32 %v3989_v50, %v1504_v49 }
 0x370   : > { %v4061_v0 = vpop.eup %2922  ;;  %v1551_v38 = vmul.f32 1.442695, %v1527_v30 }
 0x371   : > { %1581 = vadd.xlane.f32.xlu0 %v4061_v0  ;;  %1517 = vmax.xlane.f32.xlu2 %v4063_v1 }
 0x372   : > { %2924 = vpow2.f32 %v1551_v38 }
 0x378   : > { %v4067_v42 = vpop.eup %2924 }
 0x379   : > { %1583 = vadd.xlane.f32.xlu0 %v4067_v42 }
 0x3ac   : > { %v1568_v12 = vpop.xlane.xlu2 %1567 }
 0x3ad   : > { %2926 = vrcp.f32 %v1568_v12 }
 0x3b3   : > { %v2927_v40 = vpop.eup %2926 }
 0x3b4   : > { %v1570_v18 = vpop.xlane.xlu0 %1569  ;;  %v1506_v14 = vpop.xlane.xlu2 %1505  ;;  %v1615_v39 = vmul.f32 %v2927_v40, %v4017_v17 }
 0x3b5   : > { %2928 = vrcp.f32 %v1570_v18  ;;  %v1528_v50 = vsub.f32 %v4014_v53, %v1506_v14 }
 0x3b7   : > { %v1553_v28 = vmul.f32 1.442695, %v1528_v50 }
 0x3b9   : > { %2930 = vpow2.f32 %v1553_v28 }
 0x3bb   : > { %v2929_v43 = vpop.eup %2928 }
 0x3bc   : > { %v1616_v8 = vmul.f32 %v2929_v43, %v4023_v7  ;;  %v1572_v19 = vpop.xlane.xlu0 %1571  ;;  %v1508_v9 = vpop.xlane.xlu2 %1507  ;;  %v2751_v7 = vld [vmem:[%s3595_s18 + $0x74] sm:$0xf] }
 0x3bd   : > { %v1529_v62 = vsub.f32 %v4020_v31, %v1508_v9  ;;  %v2656_v31 = vld [vmem:[%s3595_s18 + $0x70] sm:$0xf] }
 0x3be   : > { %v1631_v59 = vpack.c.bf16 %v1616_v8, %v1615_v39  ;;  %v2657_v11 = vor.u32 %v2752_v44, %v2656_v31  ;;  %v2748_v8 = vld [vmem:[%s3595_s18 + $0x54] sm:$0xf0]  ;;  %v2618_v31 = vld [vmem:[%s3595_s18 + $0x28] sm:$0xf0] }
 0x3bf   : > { %v4074_v4 = vpop.eup %2930  ;;  %v1555_v63 = vmul.f32 1.442695, %v1529_v62  ;;  %v2642_v62 = vld [vmem:[%s3595_s18 + $0x58] sm:$0xf0] }
 0x3c0   : > { %1647 = vmatmul.bf16.vlgmr.msra.gmra.mxu3 %v1631_v59  ;;  %1585 = vadd.xlane.f32.xlu1 %v4074_v4  ;;  %v2632_v59 = vld [vmem:[%s3595_s18 + $0x40] sm:$0xf] }
 0x3c1   : > { %2932 = vpow2.f32 %v1555_v63  ;;  %1824 = vmatpush.bf16.msra.mxu0 %v2657_v11  ;;  %v2746_v63 = vld [vmem:[%s3595_s18 + $0x44] sm:$0xf0]  ;;  %v2740_v11 = vld [vmem:[%s3595_s18 + $0x14] sm:$0xf0] }
 0x3c2   : > { %2934 = vrcp.f32 %v1572_v19  ;;  %v2747_v19 = vld [vmem:[%s3595_s18 + $0x54] sm:$0xf] }
 0x3c4   : > { %v1574_v61 = vpop.xlane.xlu1 %1573  ;;  %v1510_v41 = vpop.xlane.xlu0 %1509 }
 0x3c5   : > { %2936 = vrcp.f32 %v1574_v61  ;;  %v1530_v46 = vsub.f32 %v4030_v27, %v1510_v41  ;;  %v2661_v27 = vor.u32 %v2751_v7, %v2658_v54  ;;  %v2745_v61 = vld [vmem:[%s3595_s18 + $0x44] sm:$0xf]  ;;  %v2633_v41 = vor.u32 %v2746_v63, %v2632_v59  ;;  %v2608_v7 = vld [vmem:[%s3595_s18 + $0x10] sm:$0xf]  ;;  %v2739_v54 = vld [vmem:[%s3595_s18 + $0x14] sm:$0xf] }
 0x3c7   : > { %v4078_v5 = vpop.eup %2932  ;;  %v1557_v60 = vmul.f32 1.442695, %v1530_v46  ;;  %1873 = vmatpush.bf16.msra.mxu1 %v2661_v27 }
 0x3c8   : > { %1587 = vadd.xlane.f32.xlu2 %v4078_v5  ;;  %v2935_v15 = vpop.eup %2934 }
 0x3c9   : > { %2938 = vpow2.f32 %v1557_v60  ;;  %v1617_v53 = vmul.f32 %v2935_v15, %v4028_v26  ;;  %v2750_v26 = vld [vmem:[%s3595_s18 + $0x64] sm:$0xf0]  ;;  %v2624_v60 = vld [vmem:[%s3595_s18 + $0x30] sm:$0xf]  ;;  %v2744_v15 = vld [vmem:[%s3595_s18 + $0x34] sm:$0xf0] }
 0x3ca   : > { %v2649_v45 = vor.u32 %v2750_v26, %v2648_v10  ;;  %v2609_v10 = vor.u32 %v2740_v11, %v2608_v7  ;;  %v2610_v26 = vld [vmem:[%s3595_s18 + $0x18] sm:$0xf0] }
 0x3cb   : > { %v2937_v6 = vpop.eup %2936  ;;  %v2613_v27 = vor.u32 %v2739_v54, %v2610_v26  ;;  %v1692_v26 = vld [vmem:[%s3614_s12 + $0x20] sm:$0xff] }
 0x3cc   : > { %v1576_v47 = vpop.xlane.xlu1 %1575  ;;  %v1512_v57 = vpop.xlane.xlu0 %1511  ;;  %v1618_v29 = vmul.f32 %v2937_v6, %v4035_v13  ;;  %1825 = vmatpush.bf16.msra.mxu0 %v2649_v45  ;;  %v2743_v6 = vld [vmem:[%s3595_s18 + $0x34] sm:$0xf]  ;;  %v2737_v45 = vld [vmem:[%s3595_s18 + $0x4] sm:$0xf] }
 0x3cd   : > { %v1531_v37 = vsub.f32 %v4039_v51, %v1512_v57  ;;  %v2653_v51 = vor.u32 %v2749_v32, %v2650_v55  ;;  %v2626_v57 = vld [vmem:[%s3595_s18 + $0x38] sm:$0xf0]  ;;  %v2600_v32 = vld [vmem:[%s3595_s18] sm:$0xf]  ;;  %v2738_v55 = vld [vmem:[%s3595_s18 + $0x4] sm:$0xf0] }
 0x3ce   : > { %v1632_v17 = vpack.c.bf16 %v1618_v29, %v1617_v53  ;;  %v2629_v53 = vor.u32 %v2743_v6, %v2626_v57  ;;  %v2616_v29 = vld [vmem:[%s3595_s18 + $0x20] sm:$0xf]  ;;  %v1689_v57 = vld [vmem:[%s3614_s12 + $0x8] sm:$0xff] }
 0x3cf   : > { %v4084_v20 = vpop.eup %2938  ;;  %v1559_v56 = vmul.f32 1.442695, %v1531_v37  ;;  %1874 = vmatpush.bf16.msra.mxu1 %v2653_v51  ;;  %v2742_v37 = vld [vmem:[%s3595_s18 + $0x24] sm:$0xf0] }
 0x3d0   : > { %1652 = vmatmul.bf16.gmra.mxu3 %v1632_v17  ;;  %1589 = vadd.xlane.f32.xlu0 %v4084_v20  ;;  %v2741_v17 = vld [vmem:[%s3595_s18 + $0x24] sm:$0xf] }
 0x3d1   : > { %2940 = vpow2.f32 %v1559_v56  ;;  %v2617_v56 = vor.u32 %v2742_v37, %v2616_v29  ;;  %v2621_v44 = vor.u32 %v2741_v17, %v2618_v31  ;;  %v1691_v31 = vld [vmem:[%s3614_s12 + $0x18] sm:$0xff] }
 0x3d2   : > { %2942 = vrcp.f32 %v1576_v47  ;;  %v2625_v47 = vor.u32 %v2744_v15, %v2624_v60 }
 0x3d4   : > { %v1578_v13 = vpop.xlane.xlu2 %1577  ;;  %v1514_v16 = vpop.xlane.xlu1 %1513 }
 0x3d5   : > { %2944 = vrcp.f32 %v1578_v13  ;;  %v1532_v33 = vsub.f32 %v4046_v2, %v1514_v16  ;;  %v2601_v13 = vor.u32 %v2738_v55, %v2600_v32  ;;  %v2602_v16 = vld [vmem:[%s3595_s18 + $0x8] sm:$0xf0] }
 0x3d6   : > { %v2605_v51 = vor.u32 %v2737_v45, %v2602_v16 }
 0x3d7   : > { %v4096_v34 = vpop.eup %2940  ;;  %v1561_v21 = vmul.f32 1.442695, %v1532_v33 }
 0x3d8   : > { %1591 = vadd.xlane.f32.xlu1 %v4096_v34  ;;  %v2943_v22 = vpop.eup %2942 }
 0x3d9   : > { %2946 = vpow2.f32 %v1561_v21  ;;  %v1619_v52 = vmul.f32 %v2943_v22, %v4042_v48 }
 0x3db   : > { %v2945_v3 = vpop.eup %2944 }
 0x3dc   : > { %v1580_v36 = vpop.xlane.xlu2 %1579  ;;  %v1516_v58 = vpop.xlane.xlu1 %1515  ;;  %v1620_v25 = vmul.f32 %v2945_v3, %v4049_v35 }
 0x3dd   : > { %v1533_v49 = vsub.f32 %v4053_v24, %v1516_v58 }
 0x3de   : > { %v1633_v30 = vpack.c.bf16 %v1620_v25, %v1619_v52 }
 0x3df   : > { %v4102_v2 = vpop.eup %2946  ;;  %v1563_v38 = vmul.f32 1.442695, %v1533_v49 }
 0x3e0   : > { %1657 = vmatmul.bf16.gmra.mxu3 %v1633_v30  ;;  %1593 = vadd.xlane.f32.xlu2 %v4102_v2 }
 0x3e1   : > { %2948 = vpow2.f32 %v1563_v38 }
 0x3e2   : > { %2950 = vrcp.f32 %v1580_v36 }
 0x3e4   : > { %v1582_v12 = vpop.xlane.xlu0 %1581  ;;  %v1518_v18 = vpop.xlane.xlu2 %1517 }
 0x3e5   : > { %2952 = vrcp.f32 %v1582_v12  ;;  %v1534_v48 = vsub.f32 %v4063_v1, %v1518_v18  ;;  %v2640_v1 = vld [vmem:[%s3595_s18 + $0x50] sm:$0xf] }
 0x3e6   : > { %v2641_v9 = vor.u32 %v2748_v8, %v2640_v1 }
 0x3e7   : > { %v4106_v35 = vpop.eup %2948  ;;  %v1565_v24 = vmul.f32 1.442695, %v1534_v48 }
 0x3e8   : > { %1595 = vadd.xlane.f32.xlu0 %v4106_v35  ;;  %v2951_v14 = vpop.eup %2950  ;;  %1826 = vmatpush.bf16.msra.mxu0 %v2641_v9 }
 0x3e9   : > { %2954 = vpow2.f32 %v1565_v24  ;;  %v1621_v28 = vmul.f32 %v2951_v14, %v4056_v23  ;;  %v2645_v23 = vor.u32 %v2747_v19, %v2642_v62 }
 0x3eb   : > { %v2953_v50 = vpop.eup %2952  ;;  %1875 = vmatpush.bf16.msra.mxu1 %v2645_v23 }
 0x3ec   : > { %v1622_v40 = vmul.f32 %v2953_v50, %v4061_v0  ;;  %v2634_v0 = vld [vmem:[%s3595_s18 + $0x48] sm:$0xf0]  ;;  %1827 = vmatpush.bf16.msra.mxu0 %v2633_v41  ;;  %v1584_v33 = vpop.xlane.xlu0 %1583 }
 0x3ed   : > { %v2637_v46 = vor.u32 %v2745_v61, %v2634_v0  ;;  %2956 = vrcp.f32 %v1584_v33  ;;  %v1694_v33 = vld [vmem:[%s3614_s12 + $0x30] sm:$0xff] }
 0x3ee   : > { %v1634_v43 = vpack.c.bf16 %v1622_v40, %v1621_v28 }
 0x3ef   : > { %v4111_v39 = vpop.eup %2954  ;;  %1876 = vmatpush.bf16.msra.mxu1 %v2637_v46 }
 0x3f0   : > { %1662 = vmatmul.bf16.gmra.mxu3 %v1634_v43  ;;  %1597 = vadd.xlane.f32.xlu1 %v4111_v39 }
 0x3f1   : > { %1828 = vmatpush.bf16.msra.mxu0 %v2625_v47  ;;  %v1688_v47 = vld [vmem:[%s3614_s12] sm:$0xff] }
 0x3f3   : > { %1877 = vmatpush.bf16.msra.mxu1 %v2629_v53  ;;  %v2957_v22 = vpop.eup %2956 }
 0x3f4   : > { %v1623_v36 = vmul.f32 %v2957_v22, %v4067_v42 }
 0x3f5   : > { %1829 = vmatpush.bf16.msra.mxu0 %v2617_v56  ;;  %v1690_v56 = vld [vmem:[%s3614_s12 + $0x10] sm:$0xff] }
 0x3f7   : > { %1878 = vmatpush.bf16.msra.mxu1 %v2621_v44 }
 0x3f9   : > { %1830 = vmatpush.bf16.msra.mxu0 %v2609_v10 }
 0x3fb   : > { %1879 = vmatpush.bf16.msra.mxu1 %v2613_v27  ;;  %v1693_v27 = vld [vmem:[%s3614_s12 + $0x28] sm:$0xff] }
 0x3fd   : > { %1831 = vmatpush.bf16.msra.mxu0 %v2601_v13 }
 0x3ff   : > { %1880 = vmatpush.bf16.msra.mxu1 %v2605_v51 }
 0x433   : > { %v1586_v21 = vpop.xlane.xlu1 %1585 }
 0x434   : > { %2958 = vrcp.f32 %v1586_v21  ;;  %v1695_v21 = vld [vmem:[%s3614_s12 + $0x38] sm:$0xff] }
 0x43a   : > { %v2959_v3 = vpop.eup %2958 }
 0x43b   : > { %v1624_v58 = vmul.f32 %v2959_v3, %v4074_v4  ;;  %v1588_v25 = vpop.xlane.xlu2 %1587 }
 0x43c   : > { %2960 = vrcp.f32 %v1588_v25  ;;  %v1696_v25 = vld [vmem:[%s3614_s12 + $0x40] sm:$0xff] }
 0x43d   : > { %v1635_v52 = vpack.c.bf16 %v1624_v58, %v1623_v36 }
 0x43f   : > { %1667 = vmatmul.bf16.gmra.mxu3 %v1635_v52 }
 0x442   : > { %v2961_v38 = vpop.eup %2960 }
 0x443   : > { %v1648_v49 = vpop.f32.mrf.mxu3  ;;  %v1590_v30 = vpop.xlane.xlu0 %1589  ;;  %v1625_v48 = vmul.f32 %v2961_v38, %v4078_v5 }
 0x444   : > { %2962 = vrcp.f32 %v1590_v30 }
 0x44a   : > { %v2963_v12 = vpop.eup %2962 }
 0x44b   : > { %v1650_v18 = vpop.f32.mrf.mxu3  ;;  %v1626_v24 = vmul.f32 %v2963_v12, %v4084_v20  ;;  %v1592_v42 = vpop.xlane.xlu1 %1591 }
 0x44c   : > { %v1720_v14 = vpack.c.bf16 %v1650_v18, %v1648_v49  ;;  %2964 = vrcp.f32 %v1592_v42  ;;  %v1697_v49 = vld [vmem:[%s3614_s12 + $0x48] sm:$0xff] }
 0x44d   : > { %v1636_v50 = vpack.c.bf16 %v1626_v24, %v1625_v48 }
 0x44e   : > { %1832 = vmatmul.bf16.vlgmr.msra.gmra.mxu0 %v1720_v14  ;;  %1881 = vmatmul.bf16.vlgmr.msra.gmra.mxu1 %v1720_v14  ;;  %v1698_v14 = vld [vmem:[%s3614_s12 + $0x50] sm:$0xff] }
 0x44f   : > { %1672 = vmatmul.bf16.gmra.mxu3 %v1636_v50  ;;  %v1699_v50 = vld [vmem:[%s3614_s12 + $0x58] sm:$0xff] }
 0x452   : > { %v2965_v40 = vpop.eup %2964 }
 0x453   : > { %v1653_v4 = vpop.f32.mrf.mxu3  ;;  %v1594_v28 = vpop.xlane.xlu2 %1593  ;;  %v1627_v8 = vmul.f32 %v2965_v40, %v4096_v34 }
 0x454   : > { %2966 = vrcp.f32 %v1594_v28 }
 0x45a   : > { %v2967_v43 = vpop.eup %2966 }
 0x45b   : > { %v1655_v1 = vpop.f32.mrf.mxu3  ;;  %v1628_v19 = vmul.f32 %v2967_v43, %v4102_v2  ;;  %v1596_v20 = vpop.xlane.xlu0 %1595 }
 0x45c   : > { %v1721_v5 = vpack.c.bf16 %v1655_v1, %v1653_v4  ;;  %2968 = vrcp.f32 %v1596_v20  ;;  %v1700_v1 = vld [vmem:[%s3614_s12 + $0x60] sm:$0xff] }
 0x45d   : > { %v1637_v9 = vpack.c.bf16 %v1628_v19, %v1627_v8  ;;  %v1701_v8 = vld [vmem:[%s3614_s12 + $0x68] sm:$0xff] }
 0x45e   : > { %1837 = vmatmul.bf16.gmra.mxu0 %v1721_v5  ;;  %1886 = vmatmul.bf16.gmra.mxu1 %v1721_v5 }
 0x45f   : > { %1677 = vmatmul.bf16.gmra.mxu3 %v1637_v9 }
 0x462   : > { %v2969_v63 = vpop.eup %2968 }
 0x463   : > { %v1658_v62 = vpop.f32.mrf.mxu3  ;;  %v1598_v59 = vpop.xlane.xlu1 %1597  ;;  %v1629_v0 = vmul.f32 %v2969_v63, %v4106_v35  ;;  %v1702_v63 = vld [vmem:[%s3614_s12 + $0x70] sm:$0xff] }
 0x464   : > { %2970 = vrcp.f32 %v1598_v59 }
 0x46a   : > { %v2971_v23 = vpop.eup %2970 }
 0x46b   : > { %v1660_v61 = vpop.f32.mrf.mxu3  ;;  %v1630_v34 = vmul.f32 %v2971_v23, %v4111_v39  ;;  %v1703_v23 = vld [vmem:[%s3614_s12 + $0x78] sm:$0xff] }
 0x46c   : > { %v1722_v2 = vpack.c.bf16 %v1660_v61, %v1658_v62 }
 0x46d   : > { %v1638_v41 = vpack.c.bf16 %v1630_v34, %v1629_v0 }
 0x46e   : > { %1842 = vmatmul.bf16.gmra.mxu0 %v1722_v2  ;;  %1891 = vmatmul.bf16.gmra.mxu1 %v1722_v2 }
 0x46f   : > { %1682 = vmatmul.bf16.gmra.mxu3 %v1638_v41  ;;  %v1704_v41 = vld [vmem:[%s3614_s12 + $0x80] sm:$0xff] }
 0x473   : > { %v1663_v46 = vpop.f32.mrf.mxu3 }
 0x47b   : > { %v1665_v60 = vpop.f32.mrf.mxu3 }
 0x47c   : > { %v1723_v15 = vpack.c.bf16 %v1665_v60, %v1663_v46  ;;  %v1705_v46 = vld [vmem:[%s3614_s12 + $0x88] sm:$0xff] }
 0x47e   : > { %1847 = vmatmul.bf16.gmra.mxu0 %v1723_v15  ;;  %1896 = vmatmul.bf16.gmra.mxu1 %v1723_v15 }
 0x4c2   : > { %v1668_v6 = vpop.f32.mrf.mxu3 }
 0x4ca   : > { %v1670_v35 = vpop.f32.mrf.mxu3 }
 0x4cb   : > { %v1724_v53 = vpack.c.bf16 %v1670_v35, %v1668_v6  ;;  %v1833_v39 = vpop.f32.mrf.mxu0  ;;  %v1882_v29 = vpop.f32.mrf.mxu1  ;;  %v1707_v35 = vld [vmem:[%s3614_s12 + $0x98] sm:$0xff] }
 0x4cc   : > { %v1922_v37 = vadd.f32 %v1833_v39, %v1688_v47  ;;  %v1923_v17 = vadd.f32 %v1882_v29, %v1689_v57  ;;  %v1706_v57 = vld [vmem:[%s3614_s12 + $0x90] sm:$0xff] }
 0x4cd   : > { %1852 = vmatmul.bf16.gmra.mxu0 %v1724_v53  ;;  %1901 = vmatmul.bf16.gmra.mxu1 %v1724_v53 }
 0x4ce   : > { %1954 = vst [vmem:[%s3614_s12] sm:$0xff] %v1922_v37 }
 0x4cf   : > { %1955 = vst [vmem:[%s3614_s12 + $0x8] sm:$0xff] %v1923_v17  ;;  %v1708_v17 = vld [vmem:[%s3614_s12 + $0xa0] sm:$0xff] }
 0x4d2   : > { %v1673_v44 = vpop.f32.mrf.mxu3 }
 0x4d3   : > { %v1835_v7 = vpop.f32.mrf.mxu0  ;;  %v1884_v11 = vpop.f32.mrf.mxu1 }
 0x4d4   : > { %v1924_v54 = vadd.f32 %v1835_v7, %v1690_v56  ;;  %v1925_v10 = vadd.f32 %v1884_v11, %v1691_v31  ;;  %v1709_v56 = vld [vmem:[%s3614_s12 + $0xa8] sm:$0xff] }
 0x4d6   : > { %1956 = vst [vmem:[%s3614_s12 + $0x10] sm:$0xff] %v1924_v54  ;;  %v1710_v54 = vld [vmem:[%s3614_s12 + $0xb0] sm:$0xff] }
 0x4d7   : > { %1957 = vst [vmem:[%s3614_s12 + $0x18] sm:$0xff] %v1925_v10  ;;  %v1711_v10 = vld [vmem:[%s3614_s12 + $0xb8] sm:$0xff] }
 0x4da   : > { %v1675_v32 = vpop.f32.mrf.mxu3 }
 0x4db   : > { %v1725_v55 = vpack.c.bf16 %v1675_v32, %v1673_v44  ;;  %v1838_v45 = vpop.f32.mrf.mxu0  ;;  %v1887_v13 = vpop.f32.mrf.mxu1 }
 0x4dc   : > { %v1926_v16 = vadd.f32 %v1838_v45, %v1692_v26  ;;  %v1927_v51 = vadd.f32 %v1887_v13, %v1693_v27  ;;  %v1712_v45 = vld [vmem:[%s3614_s12 + $0xc0] sm:$0xff]  ;;  %v1713_v13 = vld [vmem:[%s3614_s12 + $0xc8] sm:$0xff] }
 0x4dd   : > { %1857 = vmatmul.bf16.gmra.mxu0 %v1725_v55  ;;  %1906 = vmatmul.bf16.gmra.mxu1 %v1725_v55 }
 0x4de   : > { %1958 = vst [vmem:[%s3614_s12 + $0x20] sm:$0xff] %v1926_v16 }
 0x4df   : > { %1959 = vst [vmem:[%s3614_s12 + $0x28] sm:$0xff] %v1927_v51 }
 0x4e2   : > { %v1678_v22 = vpop.f32.mrf.mxu3 }
 0x4e3   : > { %v1840_v3 = vpop.f32.mrf.mxu0  ;;  %v1889_v36 = vpop.f32.mrf.mxu1 }
 0x4e4   : > { %v1928_v58 = vadd.f32 %v1840_v3, %v1694_v33  ;;  %v1929_v52 = vadd.f32 %v1889_v36, %v1695_v21  ;;  %v1715_v3 = vld [vmem:[%s3614_s12 + $0xd8] sm:$0xff] }
 0x4e6   : > { %1960 = vst [vmem:[%s3614_s12 + $0x30] sm:$0xff] %v1928_v58 }
 0x4e7   : > { %1961 = vst [vmem:[%s3614_s12 + $0x38] sm:$0xff] %v1929_v52 }
 0x4ea   : > { %v1680_v30 = vpop.f32.mrf.mxu3 }
 0x4eb   : > { %v1726_v38 = vpack.c.bf16 %v1680_v30, %v1678_v22  ;;  %v1843_v12 = vpop.f32.mrf.mxu0  ;;  %v1892_v18 = vpop.f32.mrf.mxu1  ;;  %v1714_v22 = vld [vmem:[%s3614_s12 + $0xd0] sm:$0xff]  ;;  %v1717_v30 = vld [vmem:[%s3614_s12 + $0xe8] sm:$0xff] }
 0x4ec   : > { %v1930_v48 = vadd.f32 %v1843_v12, %v1696_v25  ;;  %v1931_v24 = vadd.f32 %v1892_v18, %v1697_v49  ;;  %v1716_v49 = vld [vmem:[%s3614_s12 + $0xe0] sm:$0xff] }
 0x4ed   : > { %1862 = vmatmul.bf16.gmra.mxu0 %v1726_v38  ;;  %1911 = vmatmul.bf16.gmra.mxu1 %v1726_v38 }
 0x4ee   : > { %1962 = vst [vmem:[%s3614_s12 + $0x40] sm:$0xff] %v1930_v48 }
 0x4ef   : > { %1963 = vst [vmem:[%s3614_s12 + $0x48] sm:$0xff] %v1931_v24  ;;  %v1718_v24 = vld [vmem:[%s3614_s12 + $0xf0] sm:$0xff] }
 0x4f2   : > { %v1683_v42 = vpop.f32.mrf.mxu3 }
 0x4f3   : > { %v1845_v4 = vpop.f32.mrf.mxu0  ;;  %v1894_v28 = vpop.f32.mrf.mxu1 }
 0x4f4   : > { %v1932_v40 = vadd.f32 %v1845_v4, %v1698_v14  ;;  %v1933_v43 = vadd.f32 %v1894_v28, %v1699_v50  ;;  %v1719_v14 = vld [vmem:[%s3614_s12 + $0xf8] sm:$0xff] }
 0x4f6   : > { %1964 = vst [vmem:[%s3614_s12 + $0x50] sm:$0xff] %v1932_v40 }
 0x4f7   : > { %1965 = vst [vmem:[%s3614_s12 + $0x58] sm:$0xff] %v1933_v43 }
 0x4fa   : > { %v1685_v19 = vpop.f32.mrf.mxu3 }
 0x4fb   : > { %v1727_v5 = vpack.c.bf16 %v1685_v19, %v1683_v42  ;;  %v1848_v9 = vpop.f32.mrf.mxu0  ;;  %v1897_v20 = vpop.f32.mrf.mxu1 }
 0x4fc   : > { %v1934_v62 = vadd.f32 %v1848_v9, %v1700_v1  ;;  %v1935_v59 = vadd.f32 %v1897_v20, %v1701_v8 }
 0x4fd   : > { %1867 = vmatmul.bf16.gmra.mxu0 %v1727_v5  ;;  %1916 = vmatmul.bf16.gmra.mxu1 %v1727_v5 }
 0x4fe   : > { %1966 = vst [vmem:[%s3614_s12 + $0x60] sm:$0xff] %v1934_v62 }
 0x4ff   : > { %1967 = vst [vmem:[%s3614_s12 + $0x68] sm:$0xff] %v1935_v59 }
 0x503   : > { %v1850_v61 = vpop.f32.mrf.mxu0  ;;  %v1899_v0 = vpop.f32.mrf.mxu1 }
 0x504   : > { %v1936_v34 = vadd.f32 %v1850_v61, %v1702_v63  ;;  %v1937_v2 = vadd.f32 %v1899_v0, %v1703_v23 }
 0x506   : > { %1968 = vst [vmem:[%s3614_s12 + $0x70] sm:$0xff] %v1936_v34 }
 0x507   : > { %1969 = vst [vmem:[%s3614_s12 + $0x78] sm:$0xff] %v1937_v2 }
 0x54a   : > { %v1853_v60 = vpop.f32.mrf.mxu0  ;;  %v1902_v15 = vpop.f32.mrf.mxu1 }
 0x54b   : > { %v1938_v6 = vadd.f32 %v1853_v60, %v1704_v41  ;;  %v1939_v47 = vadd.f32 %v1902_v15, %v1705_v46 }
 0x54d   : > { %1970 = vst [vmem:[%s3614_s12 + $0x80] sm:$0xff] %v1938_v6 }
 0x54e   : > { %1971 = vst [vmem:[%s3614_s12 + $0x88] sm:$0xff] %v1939_v47 }
 0x552   : > { %v1855_v53 = vpop.f32.mrf.mxu0  ;;  %v1904_v39 = vpop.f32.mrf.mxu1 }
 0x553   : > { %v1940_v29 = vadd.f32 %v1855_v53, %v1706_v57  ;;  %v1941_v37 = vadd.f32 %v1904_v39, %v1707_v35 }
 0x555   : > { %1972 = vst [vmem:[%s3614_s12 + $0x90] sm:$0xff] %v1940_v29 }
 0x556   : > { %1973 = vst [vmem:[%s3614_s12 + $0x98] sm:$0xff] %v1941_v37 }
 0x55a   : > { %v1858_v31 = vpop.f32.mrf.mxu0  ;;  %v1907_v44 = vpop.f32.mrf.mxu1 }
 0x55b   : > { %v1942_v7 = vadd.f32 %v1858_v31, %v1708_v17  ;;  %v1943_v11 = vadd.f32 %v1907_v44, %v1709_v56 }
 0x55d   : > { %1974 = vst [vmem:[%s3614_s12 + $0xa0] sm:$0xff] %v1942_v7 }
 0x55e   : > { %1975 = vst [vmem:[%s3614_s12 + $0xa8] sm:$0xff] %v1943_v11 }
 0x562   : > { %v1860_v26 = vpop.f32.mrf.mxu0  ;;  %v1909_v27 = vpop.f32.mrf.mxu1 }
 0x563   : > { %v1944_v32 = vadd.f32 %v1860_v26, %v1710_v54  ;;  %v1945_v55 = vadd.f32 %v1909_v27, %v1711_v10 }
 0x565   : > { %1976 = vst [vmem:[%s3614_s12 + $0xb0] sm:$0xff] %v1944_v32 }
 0x566   : > { %1977 = vst [vmem:[%s3614_s12 + $0xb8] sm:$0xff] %v1945_v55 }
 0x56a   : > { %v1863_v16 = vpop.f32.mrf.mxu0  ;;  %v1912_v51 = vpop.f32.mrf.mxu1 }
 0x56b   : > { %v1946_v33 = vadd.f32 %v1863_v16, %v1712_v45  ;;  %v1947_v21 = vadd.f32 %v1912_v51, %v1713_v13 }
 0x56d   : > { %1978 = vst [vmem:[%s3614_s12 + $0xc0] sm:$0xff] %v1946_v33 }
 0x56e   : > { %1979 = vst [vmem:[%s3614_s12 + $0xc8] sm:$0xff] %v1947_v21 }
 0x572   : > { %v1865_v36 = vpop.f32.mrf.mxu0  ;;  %v1914_v58 = vpop.f32.mrf.mxu1 }
 0x573   : > { %v1948_v52 = vadd.f32 %v1865_v36, %v1714_v22  ;;  %v1949_v25 = vadd.f32 %v1914_v58, %v1715_v3 }
 0x575   : > { %1980 = vst [vmem:[%s3614_s12 + $0xd0] sm:$0xff] %v1948_v52 }
 0x576   : > { %1981 = vst [vmem:[%s3614_s12 + $0xd8] sm:$0xff] %v1949_v25 }
 0x57a   : > { %v1868_v38 = vpop.f32.mrf.mxu0  ;;  %v1917_v12 = vpop.f32.mrf.mxu1 }
 0x57b   : > { %v1950_v18 = vadd.f32 %v1868_v38, %v1716_v49  ;;  %v1951_v48 = vadd.f32 %v1917_v12, %v1717_v30 }
 0x57d   : > { %1982 = vst [vmem:[%s3614_s12 + $0xe0] sm:$0xff] %v1950_v18 }
 0x57e   : > { %1983 = vst [vmem:[%s3614_s12 + $0xe8] sm:$0xff] %v1951_v48 }
 0x582   : > { %v1870_v50 = vpop.f32.mrf.mxu0  ;;  %v1919_v42 = vpop.f32.mrf.mxu1  ;;  %1989 = sbr.rel (%p2662_p10) target bundleno = 1452 (0x5ac), region = 88 }
 0x583   : > { %v1952_v4 = vadd.f32 %v1870_v50, %v1718_v24  ;;  %v1953_v28 = vadd.f32 %v1919_v42, %v1719_v14 }
 0x585   : > { %1984 = vst [vmem:[%s3614_s12 + $0xf0] sm:$0xff] %v1952_v4 }
 0x586   : > { %1985 = vst [vmem:[%s3614_s12 + $0xf8] sm:$0xff] %v1953_v28 }
 0x587   : > { %v1990_v40 = vld [vmem:[%s3614_s12] sm:$0xff]  ;;  %v2022_v43 = vld [vmem:[%s4444_s14] sm:$0x3]  ;;  %v1991_v1 = vld [vmem:[%s3614_s12 + $0x8] sm:$0xff] }
 0x588   : > { %v4216_v8 = vperm.slane %v2022_v43, 0  ;;  %v4218_v19 = vperm.slane %v2022_v43, 1  ;;  %v1992_v5 = vld [vmem:[%s3614_s12 + $0x10] sm:$0xff]  ;;  %v1993_v9 = vld [vmem:[%s3614_s12 + $0x18] sm:$0xff]  ;;  %v1994_v20 = vld [vmem:[%s3614_s12 + $0x20] sm:$0xff] }
 0x589   : > { %v1995_v23 = vld [vmem:[%s3614_s12 + $0x28] sm:$0xff]  ;;  %v1996_v0 = vld [vmem:[%s3614_s12 + $0x30] sm:$0xff]  ;;  %v1997_v2 = vld [vmem:[%s3614_s12 + $0x38] sm:$0xff] }
 0x58a   : > { %v2028_v62 = vadd.f32 %v4216_v8, %v1990_v40  ;;  %v2029_v59 = vadd.f32 %v4218_v19, %v1991_v1  ;;  %v2030_v63 = vadd.f32 %v4216_v8, %v1992_v5  ;;  %v2031_v61 = vadd.f32 %v4218_v19, %v1993_v9  ;;  %v1998_v46 = vld [vmem:[%s3614_s12 + $0x40] sm:$0xff]  ;;  %v1999_v15 = vld [vmem:[%s3614_s12 + $0x48] sm:$0xff]  ;;  %v2000_v47 = vld [vmem:[%s3614_s12 + $0x50] sm:$0xff] }
 0x58b   : > { %v2032_v34 = vadd.f32 %v4216_v8, %v1994_v20  ;;  %v2033_v41 = vadd.f32 %v4218_v19, %v1995_v23  ;;  %v2034_v60 = vadd.f32 %v4216_v8, %v1996_v0  ;;  %v2035_v6 = vadd.f32 %v4218_v19, %v1997_v2  ;;  %v2001_v35 = vld [vmem:[%s3614_s12 + $0x58] sm:$0xff]  ;;  %v2002_v39 = vld [vmem:[%s3614_s12 + $0x60] sm:$0xff]  ;;  %v2003_v37 = vld [vmem:[%s3614_s12 + $0x68] sm:$0xff] }
 0x58c   : > { %2060 = vst [vmem:[%s3614_s12] sm:$0xff] %v2028_v62  ;;  %v2036_v57 = vadd.f32 %v4216_v8, %v1998_v46  ;;  %v2037_v53 = vadd.f32 %v4218_v19, %v1999_v15  ;;  %v2038_v29 = vadd.f32 %v4216_v8, %v2000_v47  ;;  %v2039_v17 = vadd.f32 %v4218_v19, %v2001_v35  ;;  %v2004_v56 = vld [vmem:[%s3614_s12 + $0x70] sm:$0xff]  ;;  %v2005_v44 = vld [vmem:[%s3614_s12 + $0x78] sm:$0xff]  ;;  %v2006_v11 = vld [vmem:[%s3614_s12 + $0x80] sm:$0xff] }
 0x58d   : > { %2061 = vst [vmem:[%s3614_s12 + $0x8] sm:$0xff] %v2029_v59  ;;  %v2040_v31 = vadd.f32 %v4216_v8, %v2002_v39  ;;  %v2041_v7 = vadd.f32 %v4218_v19, %v2003_v37  ;;  %v2042_v54 = vadd.f32 %v4216_v8, %v2004_v56  ;;  %v2007_v10 = vld [vmem:[%s3614_s12 + $0x88] sm:$0xff]  ;;  %v2043_v26 = vadd.f32 %v4218_v19, %v2005_v44  ;;  %v2008_v27 = vld [vmem:[%s3614_s12 + $0x90] sm:$0xff]  ;;  %v2009_v55 = vld [vmem:[%s3614_s12 + $0x98] sm:$0xff] }
 0x58e   : > { %2062 = vst [vmem:[%s3614_s12 + $0x10] sm:$0xff] %v2030_v63  ;;  %v2044_v32 = vadd.f32 %v4216_v8, %v2006_v11  ;;  %v2045_v45 = vadd.f32 %v4218_v19, %v2007_v10  ;;  %v2010_v13 = vld [vmem:[%s3614_s12 + $0xa0] sm:$0xff]  ;;  %v2046_v16 = vadd.f32 %v4216_v8, %v2008_v27  ;;  %v2011_v51 = vld [vmem:[%s3614_s12 + $0xa8] sm:$0xff]  ;;  %v2047_v33 = vadd.f32 %v4218_v19, %v2009_v55  ;;  %v2012_v21 = vld [vmem:[%s3614_s12 + $0xb0] sm:$0xff] }
 0x58f   : > { %2063 = vst [vmem:[%s3614_s12 + $0x18] sm:$0xff] %v2031_v61  ;;  %v2048_v22 = vadd.f32 %v4216_v8, %v2010_v13  ;;  %v2013_v3 = vld [vmem:[%s3614_s12 + $0xb8] sm:$0xff]  ;;  %v2049_v36 = vadd.f32 %v4218_v19, %v2011_v51  ;;  %v2014_v58 = vld [vmem:[%s3614_s12 + $0xc0] sm:$0xff]  ;;  %v2050_v52 = vadd.f32 %v4216_v8, %v2012_v21  ;;  %v2015_v25 = vld [vmem:[%s3614_s12 + $0xc8] sm:$0xff] }
 0x590   : > { %2064 = vst [vmem:[%s3614_s12 + $0x20] sm:$0xff] %v2032_v34  ;;  %v2051_v49 = vadd.f32 %v4218_v19, %v2013_v3  ;;  %v2016_v30 = vld [vmem:[%s3614_s12 + $0xd0] sm:$0xff]  ;;  %v2052_v38 = vadd.f32 %v4216_v8, %v2014_v58  ;;  %v2017_v12 = vld [vmem:[%s3614_s12 + $0xd8] sm:$0xff]  ;;  %v2053_v18 = vadd.f32 %v4218_v19, %v2015_v25  ;;  %v2018_v48 = vld [vmem:[%s3614_s12 + $0xe0] sm:$0xff] }
 0x591   : > { %2065 = vst [vmem:[%s3614_s12 + $0x28] sm:$0xff] %v2033_v41  ;;  %v2054_v24 = vadd.f32 %v4216_v8, %v2016_v30  ;;  %v2019_v14 = vld [vmem:[%s3614_s12 + $0xe8] sm:$0xff]  ;;  %v2055_v50 = vadd.f32 %v4218_v19, %v2017_v12  ;;  %v2020_v42 = vld [vmem:[%s3614_s12 + $0xf0] sm:$0xff]  ;;  %v2056_v4 = vadd.f32 %v4216_v8, %v2018_v48  ;;  %v2021_v28 = vld [vmem:[%s3614_s12 + $0xf8] sm:$0xff] }
 0x592   : > { %2066 = vst [vmem:[%s3614_s12 + $0x30] sm:$0xff] %v2034_v60  ;;  %v2057_v40 = vadd.f32 %v4218_v19, %v2019_v14  ;;  %v2058_v43 = vadd.f32 %v4216_v8, %v2020_v42  ;;  %v2059_v1 = vadd.f32 %v4218_v19, %v2021_v28 }
 0x593   : > { %2067 = vst [vmem:[%s3614_s12 + $0x38] sm:$0xff] %v2035_v6 }
 0x594   : > { %2068 = vst [vmem:[%s3614_s12 + $0x40] sm:$0xff] %v2036_v57 }
 0x595   : > { %2069 = vst [vmem:[%s3614_s12 + $0x48] sm:$0xff] %v2037_v53 }
 0x596   : > { %2070 = vst [vmem:[%s3614_s12 + $0x50] sm:$0xff] %v2038_v29 }
 0x597   : > { %2071 = vst [vmem:[%s3614_s12 + $0x58] sm:$0xff] %v2039_v17 }
 0x598   : > { %2072 = vst [vmem:[%s3614_s12 + $0x60] sm:$0xff] %v2040_v31 }
 0x599   : > { %2073 = vst [vmem:[%s3614_s12 + $0x68] sm:$0xff] %v2041_v7 }
 0x59a   : > { %2074 = vst [vmem:[%s3614_s12 + $0x70] sm:$0xff] %v2042_v54 }
 0x59b   : > { %2075 = vst [vmem:[%s3614_s12 + $0x78] sm:$0xff] %v2043_v26 }
 0x59c   : > { %2076 = vst [vmem:[%s3614_s12 + $0x80] sm:$0xff] %v2044_v32 }
 0x59d   : > { %2077 = vst [vmem:[%s3614_s12 + $0x88] sm:$0xff] %v2045_v45 }
 0x59e   : > { %2078 = vst [vmem:[%s3614_s12 + $0x90] sm:$0xff] %v2046_v16 }
 0x59f   : > { %2079 = vst [vmem:[%s3614_s12 + $0x98] sm:$0xff] %v2047_v33 }
 0x5a0   : > { %2080 = vst [vmem:[%s3614_s12 + $0xa0] sm:$0xff] %v2048_v22 }
 0x5a1   : > { %2081 = vst [vmem:[%s3614_s12 + $0xa8] sm:$0xff] %v2049_v36 }
 0x5a2   : > { %2082 = vst [vmem:[%s3614_s12 + $0xb0] sm:$0xff] %v2050_v52 }
 0x5a3   : > { %2083 = vst [vmem:[%s3614_s12 + $0xb8] sm:$0xff] %v2051_v49 }
 0x5a4   : > { %2084 = vst [vmem:[%s3614_s12 + $0xc0] sm:$0xff] %v2052_v38 }
 0x5a5   : > { %2085 = vst [vmem:[%s3614_s12 + $0xc8] sm:$0xff] %v2053_v18 }
 0x5a6   : > { %2086 = vst [vmem:[%s3614_s12 + $0xd0] sm:$0xff] %v2054_v24 }
 0x5a7   : > { %2087 = vst [vmem:[%s3614_s12 + $0xd8] sm:$0xff] %v2055_v50 }
 0x5a8   : > { %2088 = vst [vmem:[%s3614_s12 + $0xe0] sm:$0xff] %v2056_v4 }
 0x5a9   : > { %2089 = vst [vmem:[%s3614_s12 + $0xe8] sm:$0xff] %v2057_v40 }
 0x5aa   : > { %2090 = vst [vmem:[%s3614_s12 + $0xf0] sm:$0xff] %v2058_v43 }
 0x5ab   : > { %2091 = vst [vmem:[%s3614_s12 + $0xf8] sm:$0xff] %v2059_v1 }
 0x5ac PF: > { %s4445_s6 = sld [smem:[#allocation23_spill]]  ;;  %s2106_s15 = sshll.u32 %s3614_s12, 4  ;;  %s2107_s15 = int_to_ptr.vmem [resolvable:$true] %s2106_s15 }
 0x5ad   : > { %s4447_s21 = sld [smem:[#allocation42_spill]]  ;;  %s2093_s11 = scalar_lea.sflag [#allocation4], %s3564_s0 }
 0x5b2   : > { %s2754_s18 = sshll.u32 %s4445_s6, 8 }
 0x5b3   : > { %s2105_s29 = scalar_lea.hbm %s4447_s21, %s2754_s18  ;;  %s3172_s3 = scalar_lea.hbm %s4447_s21, 512 }
 0x5b4   : > { %s2108_s25 = sshll.u32 %s2105_s29, 4  ;;  %s2109_s25 = int_to_ptr.hbm [resolvable:$true] %s2108_s25 }
 0x5b5   : > { %s3166_s16 = sshra.s32 %s2109_s25, 4  ;;  %s3167_s16 = int_to_ptr.hbm [resolvable:$true] %s3166_s16 }
 0x5b6   : > { %s3168_s4 = scalar_lea.hbm %s3167_s16, 256  ;;  %p3173_p0 = scmp.lt.s32.totalorder %s3167_s16, %s4447_s21 }
 0x5b7   : > { %p3169_p11 = scmp.ne.s32.totalorder %s3167_s16, %s3168_s4  ;;  %p3174_p5 = scmp.lt.s32.totalorder %s3172_s3, %s3168_s4 }
 0x5b9   : > { %p3170_p12 = pnand %p3169_p11, %p3510_p13  ;;  %p3175_p6 = por %p3174_p5, %p3173_p0 }
 0x5bb   : > { %p3171_p1 = pneg %p3170_p12 }
 0x5bd   : > { %p3176_p8 = pnand %p3175_p6, %p3171_p1 }
 0x5bf   : > { %3179 = shalt.err (!%p3176_p8)
}
 0x5c0   : > { %s3293_s0 = smov 256   ;;  %s3294_s12 = smov 16  }
 0x5c1   : > { %2783 = dma.vmem_to_hbm [thread:$0]  (%p3510_p13), %s2107_s15, 4096, %s2109_s25, %s2093_s11, %s3293_s0, %s3293_s0, %s3294_s12  }
 0x5c2 PF: > { %s4448_s9 = sld [smem:[#allocation20_spill]]  ;;  %p2809_p2 = scmp.ge.s32.totalorder %s3286_s19, 2 }
 0x5c4   : > { %p2805_p9 = pnand %p2809_p2, %p3517_p3 }
 0x5c6   : > { %p2806_p4 = pneg %p2805_p9 }
 0x5c8   : > { %s2123_s20 = sand.u32 1, %s4448_s9  }
 0x5c9   : > { %s2124_s27 = scalar_lea.sflag [#allocation4], %s2123_s20 }
 0x5ca   : > { %3241 = dma.done.wait (%p2806_p4), %s2124_s27, 4096  }
 0x5cb   : > { %3243 = vsyncadd (%p2806_p4), %s2124_s27, 4294963200  ;;  %s34_s19 = sadd.s32 1, %s3286_s19   ;;  %s4450_s28 = sld [smem:[#allocation19_spill]] }
 0x5cc   : > { %p31_p7 = scmp.ge.s32.totalorder %s34_s19, 6   ;;  %s4451_s11 = sld [smem:[#allocation27_spill]] }
 0x5cd   : > { %s4452_s8 = sld [smem:[#allocation21_spill]]  ;;  %s4457_s30 = smov %s3250_s10 }
 0x5ce   : > { %s4453_s14 = sld [smem:[#allocation28_spill]]  ;;  %s4459_s12 = smov %s3262_s13 }
 0x5cf   : > { %s4454_s16 = sld [smem:[#allocation24_spill]]  ;;  %s4461_s15 = smov %s3278_s17 }
 0x5d0   : > { %s4455_s6 = sld [smem:[#allocation25_spill]] }
 0x5d1   : > { %s4456_s18 = sld [smem:[#allocation26_spill]]  ;;  %s4458_s10 = smov %s4450_s28 }
 0x5d2   :  { %33 = sbr.rel (!%p31_p7) target bundleno = 25 (0x19), region = 176 }
 0x5d3   : > { %s4460_s13 = smov %s4452_s8 }
 0x5d6   : > { %s4462_s17 = smov %s4455_s6 }
 0x5d7   :  { %2130 = vsyncpa [#allocation3], 1 }
 0x5d8   :  { %2132 = vsyncpa [#allocation3 + $0x1], 1 }
 0x5d9   :  { %2133 = vsyncpa [#allocation6], 1 }
 0x5da   :  { %2135 = vsyncpa [#allocation6 + $0x1], 1 }
 0x5db   :  { %2136 = vsyncpa [#allocation9], 1 }
 0x5dc   :  { %2138 = vsyncpa [#allocation9 + $0x1], 1 }
 0x5dd   :  { %2139 = vsyncpa [#allocation12], 1 }
 0x5de   :  { %2141 = vsyncpa [#allocation12 + $0x1], 1 }
 0x5df   :  { %2142 = vsyncpa [#allocation4], 1 }
 0x5e0   :  { %2144 = vsyncpa [#allocation4 + $0x1], 1 }

</bundles_post_ra>
